<compile_context>
chip_gen: v6e
topology: v6e:2x2x1
jax: 0.10.0
libtpu: 0.0.40
codegen_flags: <defaults>
</compile_context>

<pallas_src>
import functools

import jax
import jax.numpy as jnp
from jax import lax
from jax.experimental import pallas as pl
from jax.experimental.pallas import tpu as pltpu

F32 = jnp.float32
VMEM_SPEC = pl.BlockSpec(memory_space=pltpu.MemorySpace.VMEM)


# ----------------------------- simple (non-gridded) kernels -----------------

def _linear_kernel(x_ref, w_ref, b_ref, o_ref):
    o_ref[...] = (jnp.dot(x_ref[...], w_ref[...],
                          preferred_element_type=jnp.float32) + b_ref[...])


def pallas_linear(x, w, b2d):
    # Used only for one-shot big-M matmuls (gate precompute); not in the scan.
    return pl.pallas_call(
        _linear_kernel,
        out_shape=jax.ShapeDtypeStruct((x.shape[0], w.shape[1]), F32),
        in_specs=[VMEM_SPEC] * 3,
        out_specs=VMEM_SPEC,
    )(x, w, b2d)


def _z_head_kernel(h_ref, wmu_ref, bmu_ref, wlv_ref, blv_ref, mu_ref, lv_ref):
    h = h_ref[...]
    mu_ref[...] = (jnp.dot(h, wmu_ref[...], preferred_element_type=jnp.float32)
                   + bmu_ref[...])
    lv_ref[...] = (jnp.dot(h, wlv_ref[...], preferred_element_type=jnp.float32)
                   + blv_ref[...])


def pallas_z_head(h, wmu, bmu, wlv, blv):
    R, D = h.shape[0], wmu.shape[1]
    return pl.pallas_call(
        _z_head_kernel,
        out_shape=(jax.ShapeDtypeStruct((R, D), F32),
                   jax.ShapeDtypeStruct((R, D), F32)),
        in_specs=[VMEM_SPEC] * 5,
        out_specs=(VMEM_SPEC, VMEM_SPEC),
    )(h, wmu, bmu, wlv, blv)


def _kl_sum_kernel(mu_ref, lv_ref, o_ref):
    mu = mu_ref[...]
    lv = lv_ref[...]
    o_ref[...] = jnp.sum((mu * mu + jnp.exp(lv) - lv - 1.0) * 0.5, keepdims=True)


def pallas_kl_sum(mu, lv):
    return pl.pallas_call(
        _kl_sum_kernel,
        out_shape=jax.ShapeDtypeStruct((1, 1), F32),
        in_specs=[VMEM_SPEC] * 2,
        out_specs=VMEM_SPEC,
    )(mu, lv)[0, 0]


# ----------------------- fused bidirectional encoder layer ------------------

def _enc_layer_kernel(gf_ref, gb_ref, whhf_ref, whhb_ref,
                      hsf_ref, hsb_ref, hf, cf, hb, cb):
    s = pl.program_id(0)

    @pl.when(s == 0)
    def _():
        hf[...] = jnp.zeros_like(hf)
        cf[...] = jnp.zeros_like(cf)
        hb[...] = jnp.zeros_like(hb)
        cb[...] = jnp.zeros_like(cb)

    H = hf.shape[-1]

    def cell(gates, h_prev, c_prev):
        # PyTorch LSTM gate order: i, f, g, o
        i = jax.nn.sigmoid(gates[:, 0:H])
        f = jax.nn.sigmoid(gates[:, H:2 * H])
        g = jnp.tanh(gates[:, 2 * H:3 * H])
        o = jax.nn.sigmoid(gates[:, 3 * H:4 * H])
        c_new = f * c_prev + i * g
        h_new = o * jnp.tanh(c_new)
        return h_new, c_new

    # forward direction (step s)
    gf = gf_ref[...] + jnp.dot(hf[...], whhf_ref[...],
                               preferred_element_type=jnp.float32)
    h_f, c_f = cell(gf, hf[...], cf[...])
    hf[...] = h_f
    cf[...] = c_f
    hsf_ref[...] = h_f

    # backward direction (step S-1-s, handled by the index_map)
    gb = gb_ref[...] + jnp.dot(hb[...], whhb_ref[...],
                               preferred_element_type=jnp.float32)
    h_b, c_b = cell(gb, hb[...], cb[...])
    hb[...] = h_b
    cb[...] = c_b
    hsb_ref[...] = h_b


def pallas_encoder_layer(gates_f, gates_b, whh_f, whh_b):
    # gates_*: (S, B, 4H) precomputed x @ W_ih + b (both biases folded in)
    S, B, G = gates_f.shape
    H = whh_f.shape[0]
    grid_spec = pltpu.PrefetchScalarGridSpec(
        num_scalar_prefetch=0,
        grid=(S,),
        in_specs=[
            pl.BlockSpec((None, B, G), lambda s: (s, 0, 0)),
            pl.BlockSpec((None, B, G), lambda s: (S - 1 - s, 0, 0)),
            pl.BlockSpec((H, G), lambda s: (0, 0)),     # W_hh fwd, resident
            pl.BlockSpec((H, G), lambda s: (0, 0)),     # W_hh bwd, resident
        ],
        out_specs=(
            pl.BlockSpec((None, B, H), lambda s: (s, 0, 0)),
            pl.BlockSpec((None, B, H), lambda s: (S - 1 - s, 0, 0)),
        ),
        scratch_shapes=[pltpu.VMEM((B, H), F32) for _ in range(4)],
    )
    return pl.pallas_call(
        _enc_layer_kernel,
        out_shape=(jax.ShapeDtypeStruct((S, B, H), F32),
                   jax.ShapeDtypeStruct((S, B, H), F32)),
        grid_spec=grid_spec,
        compiler_params=pltpu.CompilerParams(dimension_semantics=("arbitrary",)),
    )(gates_f, gates_b, whh_f, whh_b)


# ----------------------------- fused decoder loop ----------------------------

def _decoder_step_kernel(xg_ref, m_ref, eps_ref, h0_ref, e_ref, sm_ref,
                         whh_ref, cw_ref, cb_ref,
                         dout_ref, ctx_ref, kl_ref, h_scr, c_scr):
    t = pl.program_id(0)

    @pl.when(t == 0)
    def _():
        h_scr[...] = h0_ref[...]
        c_scr[...] = jnp.zeros_like(c_scr)
        kl_ref[...] = jnp.zeros_like(kl_ref)

    B, D = h_scr.shape
    h_prev = h_scr[...]
    c_prev = c_scr[...]

    # LSTMCell: x @ W_ih + b is precomputed; only h @ W_hh is done per step.
    gates = xg_ref[...] + jnp.dot(h_prev, whh_ref[...],
                                  preferred_element_type=jnp.float32)
    i = jax.nn.sigmoid(gates[:, 0:D])
    f = jax.nn.sigmoid(gates[:, D:2 * D])
    g = jnp.tanh(gates[:, 2 * D:3 * D])
    o = jax.nn.sigmoid(gates[:, 3 * D:4 * D])
    c_new = f * c_prev + i * g
    h_new = o * jnp.tanh(c_new)

    # TODO(synk): Decoder class source unavailable; standard mask-gated
    # LSTMCell (keep previous state where target_mask == 0) assumed.
    m = m_ref[...]                                       # (B, 1)
    h_cur = m * h_new + (1.0 - m) * h_prev
    c_cur = m * c_new + (1.0 - m) * c_prev
    h_scr[...] = h_cur
    c_scr[...] = c_cur
    dout_ref[...] = h_cur

    # Attention as MXU batched contractions (flash-style, query length 1).
    e = e_ref[...]                                       # (B, S, D)
    h3 = h_cur[:, None, :]                               # (B, 1, D)
    scores = jnp.einsum('bkd,bsd->bks', h3, e,
                        preferred_element_type=jnp.float32)          # (B,1,S)
    scores = jnp.where(sm_ref[...] > 0.5, scores, -1000000.0)        # masked_fill
    scores = scores - jnp.max(scores, axis=-1, keepdims=True)
    p = jnp.exp(scores)
    p = p * pl.reciprocal(jnp.sum(p, axis=-1, keepdims=True), approx=True)
    c_mu = jnp.einsum('bks,bsd->bkd', p, e,
                      preferred_element_type=jnp.float32).reshape(B, D)

    # c_ln_var = exp(Linear(tanh(context)))   (faithful to the reference)
    c_var = jnp.exp(jnp.dot(jnp.tanh(c_mu), cw_ref[...],
                            preferred_element_type=jnp.float32) + cb_ref[...])
    ctx_ref[...] = c_mu + c_var * eps_ref[...]           # rsample
    # context KL accumulated in the resident (1,1) block (faithful formula:
    # the reference feeds the already-exp'ed c_ln_var into the KL expression).
    kl_ref[...] += jnp.sum((c_mu * c_mu + jnp.exp(c_var) - c_var - 1.0) * 0.5,
                           keepdims=True)


def pallas_decoder(dec_gates, tgt_mask_t, eps_ctx, h0, e_out, src_mask3,
                   dec_whh, c_w, c_b):
    T, B, G = dec_gates.shape
    D = h0.shape[1]
    S = e_out.shape[1]
    grid_spec = pltpu.PrefetchScalarGridSpec(
        num_scalar_prefetch=0,
        grid=(T,),
        in_specs=[
            pl.BlockSpec((None, B, G), lambda t: (t, 0, 0)),   # precomputed x-gates
            pl.BlockSpec((None, B, 1), lambda t: (t, 0, 0)),   # target mask column
            pl.BlockSpec((None, B, D), lambda t: (t, 0, 0)),   # eps for rsample
            pl.BlockSpec((B, D), lambda t: (0, 0)),            # h0          (resident)
            pl.BlockSpec((B, S, D), lambda t: (0, 0, 0)),      # e_out       (resident)
            pl.BlockSpec((B, 1, S), lambda t: (0, 0, 0)),      # source mask (resident)
            pl.BlockSpec((D, G), lambda t: (0, 0)),            # W_hh        (resident)
            pl.BlockSpec((D, D), lambda t: (0, 0)),            # c_linear W  (resident)
            pl.BlockSpec((1, D), lambda t: (0, 0)),            # c_linear b  (resident)
        ],
        out_specs=(
            pl.BlockSpec((None, B, D), lambda t: (t, 0, 0)),   # decoder hidden
            pl.BlockSpec((None, B, D), lambda t: (t, 0, 0)),   # sampled context
            pl.BlockSpec((1, 1), lambda t: (0, 0)),            # context-KL accumulator
        ),
        scratch_shapes=[pltpu.VMEM((B, D), F32), pltpu.VMEM((B, D), F32)],
    )
    return pl.pallas_call(
        _decoder_step_kernel,
        out_shape=(jax.ShapeDtypeStruct((T, B, D), F32),
                   jax.ShapeDtypeStruct((T, B, D), F32),
                   jax.ShapeDtypeStruct((1, 1), F32)),
        grid_spec=grid_spec,
        compiler_params=pltpu.CompilerParams(dimension_semantics=("arbitrary",)),
    )(dec_gates, tgt_mask_t, eps_ctx, h0, e_out, src_mask3, dec_whh, c_w, c_b)


# ------------------ fused maxout + vocab projection + masked CE --------------

def _head_ce_kernel(d_ref, c_ref, lab_ref, m_ref,
                    wd1_ref, wc1_ref, wd2_ref, wc2_ref, b1_ref, b2_ref,
                    ww_ref, wb_ref, ce_ref):
    @pl.when(pl.program_id(0) == 0)
    def _():
        ce_ref[...] = jnp.zeros_like(ce_ref)

    d = d_ref[...]
    c = c_ref[...]
    # Maxout(d_d_hid + d_c_hid -> d_out, pool=2); the concat(d, context) is
    # avoided by splitting the weight rows and accumulating two dots.
    z1 = (jnp.dot(d, wd1_ref[...], preferred_element_type=jnp.float32)
          + jnp.dot(c, wc1_ref[...], preferred_element_type=jnp.float32)
          + b1_ref[...])
    z2 = (jnp.dot(d, wd2_ref[...], preferred_element_type=jnp.float32)
          + jnp.dot(c, wc2_ref[...], preferred_element_type=jnp.float32)
          + b2_ref[...])
    mo = jnp.maximum(z1, z2)
    logits = (jnp.dot(mo, ww_ref[...], preferred_element_type=jnp.float32)
              + wb_ref[...])                                   # (RB, V)

    mx = jnp.max(logits, axis=-1, keepdims=True)
    lse = jnp.log(jnp.sum(jnp.exp(logits - mx), axis=-1, keepdims=True)) + mx
    iota = lax.broadcasted_iota(jnp.int32, logits.shape, 1)
    picked = jnp.sum(jnp.where(iota == lab_ref[...], logits, 0.0),
                     axis=-1, keepdims=True)
    ce_ref[...] += jnp.sum((lse - picked) * m_ref[...], keepdims=True)


def pallas_head_ce(d, c, labels, mask, wd1, wc1, wd2, wc2, b1, b2, ww, wb):
    N, D = d.shape
    P, V = ww.shape
    row_block = N if N <= 256 else 256
    assert N % row_block == 0
    grid_spec = pltpu.PrefetchScalarGridSpec(
        num_scalar_prefetch=0,
        grid=(N // row_block,),
        in_specs=[
            pl.BlockSpec((row_block, D), lambda r: (r, 0)),
            pl.BlockSpec((row_block, D), lambda r: (r, 0)),
            pl.BlockSpec((row_block, 1), lambda r: (r, 0)),
            pl.BlockSpec((row_block, 1), lambda r: (r, 0)),
            pl.BlockSpec((D, P), lambda r: (0, 0)),
            pl.BlockSpec((D, P), lambda r: (0, 0)),
            pl.BlockSpec((D, P), lambda r: (0, 0)),
            pl.BlockSpec((D, P), lambda r: (0, 0)),
            pl.BlockSpec((1, P), lambda r: (0, 0)),
            pl.BlockSpec((1, P), lambda r: (0, 0)),
            pl.BlockSpec((P, V), lambda r: (0, 0)),
            pl.BlockSpec((1, V), lambda r: (0, 0)),
        ],
        out_specs=pl.BlockSpec((1, 1), lambda r: (0, 0)),
    )
    ce = pl.pallas_call(
        _head_ce_kernel,
        out_shape=jax.ShapeDtypeStruct((1, 1), F32),
        grid_spec=grid_spec,
        compiler_params=pltpu.CompilerParams(dimension_semantics=("arbitrary",)),
    )(d, c, labels, mask, wd1, wc1, wd2, wc2, b1, b2, ww, wb)
    return ce[0, 0]


# ------------------------------- parameters ----------------------------------

def init_params(key, d_e_hid, src_vocab, d_s_emb, tgt_vocab, d_t_emb,
                n_e_layer=2, n_dir=2):
    keys = iter(jax.random.split(key, 64))

    def init(shape, scale=0.1):
        return (scale * jax.random.normal(next(keys), shape)).astype(F32)

    H = d_e_hid
    d_d_hid = d_e_hid * n_dir
    d_c_hid = d_d_hid
    d_out = (d_d_hid + d_c_hid) // n_dir

    p = {}
    p['src_emb'] = init((src_vocab, d_s_emb))
    p['tgt_emb'] = init((tgt_vocab, d_t_emb))

    enc = []
    for l in range(n_e_layer):
        d_in = d_s_emb if l == 0 else d_e_hid * n_dir
        wih_f = init((d_in, 4 * H)); wih_b = init((d_in, 4 * H))
        b_f = init((1, 4 * H)); b_b = init((1, 4 * H))       # b_ih + b_hh folded
        enc.append(dict(
            wih=jnp.concatenate([wih_f, wih_b], axis=1),     # (d_in, 8H), both dirs
            b=jnp.concatenate([b_f, b_b], axis=1),           # (1, 8H)
            whh_f=init((H, 4 * H)),
            whh_b=init((H, 4 * H))))
    p['encoder'] = enc

    p['z_mu_w'] = init((d_d_hid, d_d_hid)); p['z_mu_b'] = init((1, d_d_hid))
    p['z_lv_w'] = init((d_d_hid, d_d_hid)); p['z_lv_b'] = init((1, d_d_hid))

    p['dec_wih'] = init((d_t_emb, 4 * d_d_hid))
    p['dec_whh'] = init((d_d_hid, 4 * d_d_hid))
    p['dec_b'] = init((1, 4 * d_d_hid))

    p['c_w'] = init((d_c_hid, d_c_hid)); p['c_b'] = init((1, d_c_hid))

    # Maxout Linear(d_d_hid + d_c_hid -> d_out*pool), pool = n_dir = 2,
    # view(..., d_out, pool).max(-1).  Split the weight by input half
    # (d_out rows vs context rows) and by pool column for the fused kernel.
    wm = init((d_d_hid + d_c_hid, d_out * n_dir))
    bm = init((1, d_out * n_dir))
    p['max_wd1'] = wm[:d_d_hid, 0::2]; p['max_wc1'] = wm[d_d_hid:, 0::2]
    p['max_wd2'] = wm[:d_d_hid, 1::2]; p['max_wc2'] = wm[d_d_hid:, 1::2]
    p['max_b1'] = bm[:, 0::2]; p['max_b2'] = bm[:, 1::2]

    p['w_w'] = init((d_out, tgt_vocab)); p['w_b'] = init((1, tgt_vocab))
    return p


# ------------------------------- JAX glue ------------------------------------

def transform_true(hidden, n_e_lay, n_dir):
    # (n_e_lay*n_dir, B, H) -> (n_e_lay*B, H*n_dir), directions interleaved.
    _, B, H = hidden.shape
    h = hidden.reshape(n_e_lay, n_dir, B, H)
    h = jnp.transpose(h, (0, 2, 3, 1))
    return h.reshape(n_e_lay * B, H * n_dir)


def transform_false(state, n_e_lay):
    b = state.shape[0] // n_e_lay
    return state.reshape(n_e_lay, b, -1)[0]


@functools.partial(jax.jit, static_argnames=('n_e_lay', 'n_dir', 'gamma'))
def variational_seq2seq_forward(params, source, source_mask, target, target_mask,
                                label, annealing, rng_key,
                                n_e_lay=2, n_dir=2, gamma=10.0):
    B, S = source.shape
    T = target.shape[1]
    src_mask_f = source_mask.astype(F32)
    tgt_mask_f = target_mask.astype(F32)

    # Embedder: lookup + zero padded positions.
    # TODO(synk): Embedder source unavailable; lookup * mask assumed.
    src_emb = params['src_emb'][source] * src_mask_f[:, :, None]   # (B,S,E)
    tgt_emb = params['tgt_emb'][target] * tgt_mask_f[:, :, None]   # (B,T,E)

    # ---------------- encoder (input gates precomputed per layer) -----------
    x = jnp.transpose(src_emb, (1, 0, 2))                          # (S,B,E)
    finals = []
    for layer in params['encoder']:
        d_in = x.shape[-1]
        H = layer['whh_f'].shape[0]
        gates = pallas_linear(x.reshape(S * B, d_in), layer['wih'], layer['b'])
        gates = gates.reshape(S, B, 8 * H)
        hs_f, hs_b = pallas_encoder_layer(gates[:, :, :4 * H],
                                          gates[:, :, 4 * H:],
                                          layer['whh_f'], layer['whh_b'])
        finals += [hs_f[-1], hs_b[0]]          # PyTorch h_n order per layer
        x = jnp.concatenate([hs_f, hs_b], axis=-1)                 # (S,B,2H)
        # TODO(synk): inter-layer LSTM dropout (p=0.333) and pack_padded_sequence
        # masking inside Encoder are omitted (stochastic / source not available).
    e_out = jnp.transpose(x, (1, 0, 2))                            # (B,S,2H)
    hidden = jnp.stack(finals, axis=0)                             # (2*n_e_lay,B,H)

    # ---------------- variational latent ------------------------------------
    h = transform_true(hidden, n_e_lay, n_dir)                     # (n_e_lay*B, D)
    z_mu, z_lv = pallas_z_head(h, params['z_mu_w'], params['z_mu_b'],
                               params['z_lv_w'], params['z_lv_b'])
    k1, k2 = jax.random.split(rng_key)
    eps_z = jax.random.normal(k1, z_mu.shape, F32)
    # Faithful to the reference: Normal(mu, ln_var) treats ln_var as the *scale*.
    z = z_mu + z_lv * eps_z
    h0 = transform_false(z, n_e_lay)                               # (B, D)
    D = h0.shape[1]

    # ---------------- fused decoder loop ------------------------------------
    tgt_emb_t = jnp.transpose(tgt_emb, (1, 0, 2))                  # (T,B,E)
    dec_gates = pallas_linear(tgt_emb_t.reshape(T * B, tgt_emb_t.shape[-1]),
                              params['dec_wih'], params['dec_b'])
    dec_gates = dec_gates.reshape(T, B, 4 * D)
    tgt_mask_t = jnp.transpose(tgt_mask_f, (1, 0))[:, :, None]     # (T,B,1)
    eps_ctx = jax.random.normal(k2, (T, B, D), F32)
    src_mask3 = src_mask_f[:, None, :]                             # (B,1,S)

    d_out_all, ctx_all, ctx_kl = pallas_decoder(
        dec_gates, tgt_mask_t, eps_ctx, h0, e_out, src_mask3,
        params['dec_whh'], params['c_w'], params['c_b'])
    total_ctx_loss = ctx_kl[0, 0] / B

    # ---------------- vocab head + masked CE (fused, logits stay in VMEM) ---
    N = T * B
    ce_sum = pallas_head_ce(
        d_out_all.reshape(N, D), ctx_all.reshape(N, D),
        jnp.transpose(label, (1, 0)).reshape(N, 1).astype(jnp.int32),
        jnp.transpose(tgt_mask_f, (1, 0)).reshape(N, 1),
        params['max_wd1'], params['max_wc1'],
        params['max_wd2'], params['max_wc2'],
        params['max_b1'], params['max_b2'],
        params['w_w'], params['w_b'])
    recon = ce_sum / B
    reg = pallas_kl_sum(z_mu, z_lv) / B
    loss = recon + annealing * (reg + gamma * total_ctx_loss)
    # TODO(synk): the PyTorch `raise ValueError` on NaN has no in-graph
    # equivalent; checked host-side in __main__ instead.
    return loss, (recon, reg, total_ctx_loss)


# --------------------------------- main --------------------------------------

if __name__ == "__main__":
    key = jax.random.PRNGKey(0)
    k_param, k_src, k_tgt, k_lab, k_noise = jax.random.split(key, 5)

    B, S, T = 2, 8, 8
    d_e_hid, d_s_emb, d_t_emb = 16, 16, 16
    src_vocab, tgt_vocab = 50, 48

    params = init_params(k_param, d_e_hid, src_vocab, d_s_emb, tgt_vocab, d_t_emb)

    source = jax.random.randint(k_src, (B, S), 0, src_vocab, dtype=jnp.int32)
    target = jax.random.randint(k_tgt, (B, T), 0, tgt_vocab, dtype=jnp.int32)
    label = jax.random.randint(k_lab, (B, T), 0, tgt_vocab, dtype=jnp.int32)
    source_mask = jnp.ones((B, S), jnp.int32).at[1, -2:].set(0)
    target_mask = jnp.ones((B, T), jnp.int32).at[1, -3:].set(0)
    annealing = 0.5

    loss, (recon, reg, ctx) = variational_seq2seq_forward(
        params, source, source_mask, target, target_mask, label,
        annealing, k_noise)
    jax.block_until_ready(loss)
    assert not bool(jnp.isnan(loss)), "nan detected"
    print("KERNEL_OK")
</pallas_src>

<mosaic_0001>
module attributes {stable_mosaic.version = 11 : i64} {
  func.func @_linear_kernel(%arg0: memref<16x32xf32, #tpu.memory_space<vmem>>, %arg1: memref<32x128xf32, #tpu.memory_space<vmem>>, %arg2: memref<1x128xf32, #tpu.memory_space<vmem>>, %arg3: memref<16x128xf32, #tpu.memory_space<vmem>>) attributes {dimension_semantics = [], scalar_prefetch = 0 : i64, scratch_operands = 0 : i64, tpu.core_type = #tpu.core_type<tc>} {
    %c0 = arith.constant 0 : index
    %c0_0 = arith.constant 0 : index
    %0 = vector.load %arg0[%c0, %c0_0] : memref<16x32xf32, #tpu.memory_space<vmem>>, vector<16x32xf32>
    %c0_1 = arith.constant 0 : index
    %c0_2 = arith.constant 0 : index
    %1 = vector.load %arg1[%c0_1, %c0_2] : memref<32x128xf32, #tpu.memory_space<vmem>>, vector<32x128xf32>
    %cst = arith.constant dense<0.000000e+00> : vector<16x128xf32>
    %2 = tpu.matmul %0, %1, %cst {dimension_numbers = #tpu.dot_dimension_numbers<[1], [0], [0], [1], [0, 0, 1, 1], [], []>} : vector<16x32xf32>, vector<32x128xf32>, vector<16x128xf32> -> vector<16x128xf32>
    %c0_3 = arith.constant 0 : index
    %c0_4 = arith.constant 0 : index
    %3 = vector.load %arg2[%c0_3, %c0_4] : memref<1x128xf32, #tpu.memory_space<vmem>>, vector<1x128xf32>
    %4 = vector.broadcast %3 : vector<1x128xf32> to vector<16x128xf32>
    %5 = arith.addf %2, %4 : vector<16x128xf32>
    %c0_5 = arith.constant 0 : index
    %c0_6 = arith.constant 0 : index
    %6 = vector.load %arg3[%c0_5, %c0_6] : memref<16x128xf32, #tpu.memory_space<vmem>>, vector<16x128xf32>
    tpu.vector_store %arg3[%c0_5, %c0_6], %5 {strides = array<i32>} : memref<16x128xf32, #tpu.memory_space<vmem>>, vector<16x128xf32>,
    return
  }
}

module attributes {stable_mosaic.version = 11 : i64} {
  func.func @_linear_kernel(%arg0: memref<16x16xf32, #tpu.memory_space<vmem>>, %arg1: memref<16x128xf32, #tpu.memory_space<vmem>>, %arg2: memref<1x128xf32, #tpu.memory_space<vmem>>, %arg3: memref<16x128xf32, #tpu.memory_space<vmem>>) attributes {dimension_semantics = [], scalar_prefetch = 0 : i64, scratch_operands = 0 : i64, tpu.core_type = #tpu.core_type<tc>} {
    %c0 = arith.constant 0 : index
    %c0_0 = arith.constant 0 : index
    %0 = vector.load %arg0[%c0, %c0_0] : memref<16x16xf32, #tpu.memory_space<vmem>>, vector<16x16xf32>
    %c0_1 = arith.constant 0 : index
    %c0_2 = arith.constant 0 : index
    %1 = vector.load %arg1[%c0_1, %c0_2] : memref<16x128xf32, #tpu.memory_space<vmem>>, vector<16x128xf32>
    %cst = arith.constant dense<0.000000e+00> : vector<16x128xf32>
    %2 = tpu.matmul %0, %1, %cst {dimension_numbers = #tpu.dot_dimension_numbers<[1], [0], [0], [1], [0, 0, 1, 1], [], []>} : vector<16x16xf32>, vector<16x128xf32>, vector<16x128xf32> -> vector<16x128xf32>
    %c0_3 = arith.constant 0 : index
    %c0_4 = arith.constant 0 : index
    %3 = vector.load %arg2[%c0_3, %c0_4] : memref<1x128xf32, #tpu.memory_space<vmem>>, vector<1x128xf32>
    %4 = vector.broadcast %3 : vector<1x128xf32> to vector<16x128xf32>
    %5 = arith.addf %2, %4 : vector<16x128xf32>
    %c0_5 = arith.constant 0 : index
    %c0_6 = arith.constant 0 : index
    %6 = vector.load %arg3[%c0_5, %c0_6] : memref<16x128xf32, #tpu.memory_space<vmem>>, vector<16x128xf32>
    tpu.vector_store %arg3[%c0_5, %c0_6], %5 {strides = array<i32>} : memref<16x128xf32, #tpu.memory_space<vmem>>, vector<16x128xf32>,
    return
  }
}

module attributes {stable_mosaic.version = 11 : i64} {
  func.func @_enc_layer_kernel(%arg0: i32, %arg1: memref<1x2x64xf32, #tpu.memory_space<vmem>>, %arg2: memref<1x2x64xf32, #tpu.memory_space<vmem>>, %arg3: memref<16x64xf32, #tpu.memory_space<vmem>>, %arg4: memref<16x64xf32, #tpu.memory_space<vmem>>, %arg5: memref<1x2x16xf32, #tpu.memory_space<vmem>>, %arg6: memref<1x2x16xf32, #tpu.memory_space<vmem>>, %arg7: memref<2x16xf32, #tpu.memory_space<vmem>>, %arg8: memref<2x16xf32, #tpu.memory_space<vmem>>, %arg9: memref<2x16xf32, #tpu.memory_space<vmem>>, %arg10: memref<2x16xf32, #tpu.memory_space<vmem>>) attributes {dimension_semantics = [#tpu.dimension_semantics<arbitrary>], iteration_bounds = array<i64: 8>, scalar_prefetch = 0 : i64, scratch_operands = 4 : i64, tpu.core_type = #tpu.core_type<tc>, window_params = [{transform_indices = @transform_0, window_bounds = array<i64: 1, 2, 64>}, {transform_indices = @transform_1, window_bounds = array<i64: 1, 2, 64>}, {pipeline_mode = #tpu.pipeline_mode<synchronous>, transform_indices = @transform_2, window_bounds = array<i64: 16, 64>}, {pipeline_mode = #tpu.pipeline_mode<synchronous>, transform_indices = @transform_3, window_bounds = array<i64: 16, 64>}, {transform_indices = @transform_4, window_bounds = array<i64: 1, 2, 16>}, {transform_indices = @transform_5, window_bounds = array<i64: 1, 2, 16>}]} {
    %c0_i32 = arith.constant 0 : i32
    %0 = arith.cmpi eq, %arg0, %c0_i32 : i32
    %1 = arith.extui %0 : i1 to i32
    %c0_i32_0 = arith.constant 0 : i32
    %2 = arith.cmpi ne, %1, %c0_i32_0 : i32
    scf.if %2 {
      %cst_39 = arith.constant 0.000000e+00 : f32
      %77 = vector.broadcast %cst_39 : f32 to vector<2x16xf32>
      %c0_40 = arith.constant 0 : index
      %c0_41 = arith.constant 0 : index
      %78 = vector.load %arg7[%c0_40, %c0_41] : memref<2x16xf32, #tpu.memory_space<vmem>>, vector<2x16xf32>
      tpu.vector_store %arg7[%c0_40, %c0_41], %77 {strides = array<i32>} : memref<2x16xf32, #tpu.memory_space<vmem>>, vector<2x16xf32>,
      %cst_42 = arith.constant 0.000000e+00 : f32
      %79 = vector.broadcast %cst_42 : f32 to vector<2x16xf32>
      %c0_43 = arith.constant 0 : index
      %c0_44 = arith.constant 0 : index
      %80 = vector.load %arg8[%c0_43, %c0_44] : memref<2x16xf32, #tpu.memory_space<vmem>>, vector<2x16xf32>
      tpu.vector_store %arg8[%c0_43, %c0_44], %79 {strides = array<i32>} : memref<2x16xf32, #tpu.memory_space<vmem>>, vector<2x16xf32>,
      %cst_45 = arith.constant 0.000000e+00 : f32
      %81 = vector.broadcast %cst_45 : f32 to vector<2x16xf32>
      %c0_46 = arith.constant 0 : index
      %c0_47 = arith.constant 0 : index
      %82 = vector.load %arg9[%c0_46, %c0_47] : memref<2x16xf32, #tpu.memory_space<vmem>>, vector<2x16xf32>
      tpu.vector_store %arg9[%c0_46, %c0_47], %81 {strides = array<i32>} : memref<2x16xf32, #tpu.memory_space<vmem>>, vector<2x16xf32>,
      %cst_48 = arith.constant 0.000000e+00 : f32
      %83 = vector.broadcast %cst_48 : f32 to vector<2x16xf32>
      %c0_49 = arith.constant 0 : index
      %c0_50 = arith.constant 0 : index
      %84 = vector.load %arg10[%c0_49, %c0_50] : memref<2x16xf32, #tpu.memory_space<vmem>>, vector<2x16xf32>
      tpu.vector_store %arg10[%c0_49, %c0_50], %83 {strides = array<i32>} : memref<2x16xf32, #tpu.memory_space<vmem>>, vector<2x16xf32>,
    } else {
    }
    %c0 = arith.constant 0 : index
    %c0_1 = arith.constant 0 : index
    %c0_2 = arith.constant 0 : index
    %3 = vector.load %arg1[%c0, %c0_1, %c0_2] : memref<1x2x64xf32, #tpu.memory_space<vmem>>, vector<1x2x64xf32>
    %4 = vector.shape_cast %3 : vector<1x2x64xf32> to vector<2x64xf32>
    %c0_3 = arith.constant 0 : index
    %c0_4 = arith.constant 0 : index
    %5 = vector.load %arg7[%c0_3, %c0_4] : memref<2x16xf32, #tpu.memory_space<vmem>>, vector<2x16xf32>
    %c0_5 = arith.constant 0 : index
    %c0_6 = arith.constant 0 : index
    %6 = vector.load %arg3[%c0_5, %c0_6] : memref<16x64xf32, #tpu.memory_space<vmem>>, vector<16x64xf32>
    %cst = arith.constant dense<0.000000e+00> : vector<2x64xf32>
    %7 = tpu.matmul %5, %6, %cst {dimension_numbers = #tpu.dot_dimension_numbers<[1], [0], [0], [1], [0, 0, 1, 1], [], []>} : vector<2x16xf32>, vector<16x64xf32>, vector<2x64xf32> -> vector<2x64xf32>
    %8 = arith.addf %4, %7 : vector<2x64xf32>
    %c0_7 = arith.constant 0 : index
    %c0_8 = arith.constant 0 : index
    %9 = vector.load %arg8[%c0_7, %c0_8] : memref<2x16xf32, #tpu.memory_space<vmem>>, vector<2x16xf32>
    %10 = vector.extract_strided_slice %8 {offsets = [0, 0], sizes = [2, 16], strides = [1, 1]} : vector<2x64xf32> to vector<2x16xf32>
    %11 = arith.negf %10 : vector<2x16xf32>
    %12 = math.exp %11 : vector<2x16xf32>
    %cst_9 = arith.constant 1.000000e+00 : f32
    %13 = vector.broadcast %cst_9 : f32 to vector<2x16xf32>
    %14 = arith.addf %13, %12 : vector<2x16xf32>
    %15 = arith.divf %13, %14 : vector<2x16xf32>
    %16 = vector.extract_strided_slice %8 {offsets = [0, 16], sizes = [2, 16], strides = [1, 1]} : vector<2x64xf32> to vector<2x16xf32>
    %17 = arith.negf %16 : vector<2x16xf32>
    %18 = math.exp %17 : vector<2x16xf32>
    %cst_10 = arith.constant 1.000000e+00 : f32
    %19 = vector.broadcast %cst_10 : f32 to vector<2x16xf32>
    %20 = arith.addf %19, %18 : vector<2x16xf32>
    %21 = arith.divf %19, %20 : vector<2x16xf32>
    %22 = vector.extract_strided_slice %8 {offsets = [0, 32], sizes = [2, 16], strides = [1, 1]} : vector<2x64xf32> to vector<2x16xf32>
    %23 = math.tanh %22 : vector<2x16xf32>
    %24 = vector.extract_strided_slice %8 {offsets = [0, 48], sizes = [2, 16], strides = [1, 1]} : vector<2x64xf32> to vector<2x16xf32>
    %25 = arith.negf %24 : vector<2x16xf32>
    %26 = math.exp %25 : vector<2x16xf32>
    %cst_11 = arith.constant 1.000000e+00 : f32
    %27 = vector.broadcast %cst_11 : f32 to vector<2x16xf32>
    %28 = arith.addf %27, %26 : vector<2x16xf32>
    %29 = arith.divf %27, %28 : vector<2x16xf32>
    %30 = arith.mulf %21, %9 : vector<2x16xf32>
    %31 = arith.mulf %15, %23 : vector<2x16xf32>
    %32 = arith.addf %30, %31 : vector<2x16xf32>
    %33 = math.tanh %32 : vector<2x16xf32>
    %34 = arith.mulf %29, %33 : vector<2x16xf32>
    %c0_12 = arith.constant 0 : index
    %c0_13 = arith.constant 0 : index
    %35 = vector.load %arg7[%c0_12, %c0_13] : memref<2x16xf32, #tpu.memory_space<vmem>>, vector<2x16xf32>
    tpu.vector_store %arg7[%c0_12, %c0_13], %34 {strides = array<i32>} : memref<2x16xf32, #tpu.memory_space<vmem>>, vector<2x16xf32>,
    %c0_14 = arith.constant 0 : index
    %c0_15 = arith.constant 0 : index
    %36 = vector.load %arg8[%c0_14, %c0_15] : memref<2x16xf32, #tpu.memory_space<vmem>>, vector<2x16xf32>
    tpu.vector_store %arg8[%c0_14, %c0_15], %32 {strides = array<i32>} : memref<2x16xf32, #tpu.memory_space<vmem>>, vector<2x16xf32>,
    %c0_16 = arith.constant 0 : index
    %c0_17 = arith.constant 0 : index
    %c0_18 = arith.constant 0 : index
    %37 = vector.load %arg5[%c0_16, %c0_17, %c0_18] : memref<1x2x16xf32, #tpu.memory_space<vmem>>, vector<1x2x16xf32>
    %38 = vector.shape_cast %37 : vector<1x2x16xf32> to vector<2x16xf32>
    %39 = vector.shape_cast %34 : vector<2x16xf32> to vector<1x2x16xf32>
    tpu.vector_store %arg5[%c0_16, %c0_17, %c0_18], %39 {strides = array<i32>} : memref<1x2x16xf32, #tpu.memory_space<vmem>>, vector<1x2x16xf32>,
    %c0_19 = arith.constant 0 : index
    %c0_20 = arith.constant 0 : index
    %c0_21 = arith.constant 0 : index
    %40 = vector.load %arg2[%c0_19, %c0_20, %c0_21] : memref<1x2x64xf32, #tpu.memory_space<vmem>>, vector<1x2x64xf32>
    %41 = vector.shape_cast %40 : vector<1x2x64xf32> to vector<2x64xf32>
    %c0_22 = arith.constant 0 : index
    %c0_23 = arith.constant 0 : index
    %42 = vector.load %arg9[%c0_22, %c0_23] : memref<2x16xf32, #tpu.memory_space<vmem>>, vector<2x16xf32>
    %c0_24 = arith.constant 0 : index
    %c0_25 = arith.constant 0 : index
    %43 = vector.load %arg4[%c0_24, %c0_25] : memref<16x64xf32, #tpu.memory_space<vmem>>, vector<16x64xf32>
    %cst_26 = arith.constant dense<0.000000e+00> : vector<2x64xf32>
    %44 = tpu.matmul %42, %43, %cst_26 {dimension_numbers = #tpu.dot_dimension_numbers<[1], [0], [0], [1], [0, 0, 1, 1], [], []>} : vector<2x16xf32>, vector<16x64xf32>, vector<2x64xf32> -> vector<2x64xf32>
    %45 = arith.addf %41, %44 : vector<2x64xf32>
    %c0_27 = arith.constant 0 : index
    %c0_28 = arith.constant 0 : index
    %46 = vector.load %arg10[%c0_27, %c0_28] : memref<2x16xf32, #tpu.memory_space<vmem>>, vector<2x16xf32>
    %47 = vector.extract_strided_slice %45 {offsets = [0, 0], sizes = [2, 16], strides = [1, 1]} : vector<2x64xf32> to vector<2x16xf32>
    %48 = arith.negf %47 : vector<2x16xf32>
    %49 = math.exp %48 : vector<2x16xf32>
    %cst_29 = arith.constant 1.000000e+00 : f32
    %50 = vector.broadcast %cst_29 : f32 to vector<2x16xf32>
    %51 = arith.addf %50, %49 : vector<2x16xf32>
    %52 = arith.divf %50, %51 : vector<2x16xf32>
    %53 = vector.extract_strided_slice %45 {offsets = [0, 16], sizes = [2, 16], strides = [1, 1]} : vector<2x64xf32> to vector<2x16xf32>
    %54 = arith.negf %53 : vector<2x16xf32>
    %55 = math.exp %54 : vector<2x16xf32>
    %cst_30 = arith.constant 1.000000e+00 : f32
    %56 = vector.broadcast %cst_30 : f32 to vector<2x16xf32>
    %57 = arith.addf %56, %55 : vector<2x16xf32>
    %58 = arith.divf %56, %57 : vector<2x16xf32>
    %59 = vector.extract_strided_slice %45 {offsets = [0, 32], sizes = [2, 16], strides = [1, 1]} : vector<2x64xf32> to vector<2x16xf32>
    %60 = math.tanh %59 : vector<2x16xf32>
    %61 = vector.extract_strided_slice %45 {offsets = [0, 48], sizes = [2, 16], strides = [1, 1]} : vector<2x64xf32> to vector<2x16xf32>
    %62 = arith.negf %61 : vector<2x16xf32>
    %63 = math.exp %62 : vector<2x16xf32>
    %cst_31 = arith.constant 1.000000e+00 : f32
    %64 = vector.broadcast %cst_31 : f32 to vector<2x16xf32>
    %65 = arith.addf %64, %63 : vector<2x16xf32>
    %66 = arith.divf %64, %65 : vector<2x16xf32>
    %67 = arith.mulf %58, %46 : vector<2x16xf32>
    %68 = arith.mulf %52, %60 : vector<2x16xf32>
    %69 = arith.addf %67, %68 : vector<2x16xf32>
    %70 = math.tanh %69 : vector<2x16xf32>
    %71 = arith.mulf %66, %70 : vector<2x16xf32>
    %c0_32 = arith.constant 0 : index
    %c0_33 = arith.constant 0 : index
    %72 = vector.load %arg9[%c0_32, %c0_33] : memref<2x16xf32, #tpu.memory_space<vmem>>, vector<2x16xf32>
    tpu.vector_store %arg9[%c0_32, %c0_33], %71 {strides = array<i32>} : memref<2x16xf32, #tpu.memory_space<vmem>>, vector<2x16xf32>,
    %c0_34 = arith.constant 0 : index
    %c0_35 = arith.constant 0 : index
    %73 = vector.load %arg10[%c0_34, %c0_35] : memref<2x16xf32, #tpu.memory_space<vmem>>, vector<2x16xf32>
    tpu.vector_store %arg10[%c0_34, %c0_35], %69 {strides = array<i32>} : memref<2x16xf32, #tpu.memory_space<vmem>>, vector<2x16xf32>,
    %c0_36 = arith.constant 0 : index
    %c0_37 = arith.constant 0 : index
    %c0_38 = arith.constant 0 : index
    %74 = vector.load %arg6[%c0_36, %c0_37, %c0_38] : memref<1x2x16xf32, #tpu.memory_space<vmem>>, vector<1x2x16xf32>
    %75 = vector.shape_cast %74 : vector<1x2x16xf32> to vector<2x16xf32>
    %76 = vector.shape_cast %71 : vector<2x16xf32> to vector<1x2x16xf32>
    tpu.vector_store %arg6[%c0_36, %c0_37, %c0_38], %76 {strides = array<i32>} : memref<1x2x16xf32, #tpu.memory_space<vmem>>, vector<1x2x16xf32>,
    return
  }
  func.func @transform_0(%arg0: i32) -> (i32, i32, i32) {
    %c0_i32 = arith.constant 0 : i32
    %c0_i32_0 = arith.constant 0 : i32
    %c0_i32_1 = arith.constant 0 : i32
    return %arg0, %c0_i32, %c0_i32_0 : i32, i32, i32
  }
  func.func @transform_1(%arg0: i32) -> (i32, i32, i32) {
    %c7_i32 = arith.constant 7 : i32
    %0 = arith.subi %c7_i32, %arg0 : i32
    %c0_i32 = arith.constant 0 : i32
    %c0_i32_0 = arith.constant 0 : i32
    %c0_i32_1 = arith.constant 0 : i32
    return %0, %c0_i32, %c0_i32_0 : i32, i32, i32
  }
  func.func @transform_2(%arg0: i32) -> (i32, i32) {
    %c0_i32 = arith.constant 0 : i32
    %c0_i32_0 = arith.constant 0 : i32
    %c0_i32_1 = arith.constant 0 : i32
    return %c0_i32, %c0_i32_0 : i32, i32
  }
  func.func @transform_3(%arg0: i32) -> (i32, i32) {
    %c0_i32 = arith.constant 0 : i32
    %c0_i32_0 = arith.constant 0 : i32
    %c0_i32_1 = arith.constant 0 : i32
    return %c0_i32, %c0_i32_0 : i32, i32
  }
  func.func @transform_4(%arg0: i32) -> (i32, i32, i32) {
    %c0_i32 = arith.constant 0 : i32
    %c0_i32_0 = arith.constant 0 : i32
    %c0_i32_1 = arith.constant 0 : i32
    return %arg0, %c0_i32, %c0_i32_0 : i32, i32, i32
  }
  func.func @transform_5(%arg0: i32) -> (i32, i32, i32) {
    %c7_i32 = arith.constant 7 : i32
    %0 = arith.subi %c7_i32, %arg0 : i32
    %c0_i32 = arith.constant 0 : i32
    %c0_i32_0 = arith.constant 0 : i32
    %c0_i32_1 = arith.constant 0 : i32
    return %0, %c0_i32, %c0_i32_0 : i32, i32, i32
  }
}

module attributes {stable_mosaic.version = 11 : i64} {
  func.func @_z_head_kernel(%arg0: memref<4x32xf32, #tpu.memory_space<vmem>>, %arg1: memref<32x32xf32, #tpu.memory_space<vmem>>, %arg2: memref<1x32xf32, #tpu.memory_space<vmem>>, %arg3: memref<32x32xf32, #tpu.memory_space<vmem>>, %arg4: memref<1x32xf32, #tpu.memory_space<vmem>>, %arg5: memref<4x32xf32, #tpu.memory_space<vmem>>, %arg6: memref<4x32xf32, #tpu.memory_space<vmem>>) attributes {dimension_semantics = [], scalar_prefetch = 0 : i64, scratch_operands = 0 : i64, tpu.core_type = #tpu.core_type<tc>} {
    %c0 = arith.constant 0 : index
    %c0_0 = arith.constant 0 : index
    %0 = vector.load %arg0[%c0, %c0_0] : memref<4x32xf32, #tpu.memory_space<vmem>>, vector<4x32xf32>
    %c0_1 = arith.constant 0 : index
    %c0_2 = arith.constant 0 : index
    %1 = vector.load %arg1[%c0_1, %c0_2] : memref<32x32xf32, #tpu.memory_space<vmem>>, vector<32x32xf32>
    %cst = arith.constant dense<0.000000e+00> : vector<4x32xf32>
    %2 = tpu.matmul %0, %1, %cst {dimension_numbers = #tpu.dot_dimension_numbers<[1], [0], [0], [1], [0, 0, 1, 1], [], []>} : vector<4x32xf32>, vector<32x32xf32>, vector<4x32xf32> -> vector<4x32xf32>
    %c0_3 = arith.constant 0 : index
    %c0_4 = arith.constant 0 : index
    %3 = vector.load %arg2[%c0_3, %c0_4] : memref<1x32xf32, #tpu.memory_space<vmem>>, vector<1x32xf32>
    %4 = vector.broadcast %3 : vector<1x32xf32> to vector<4x32xf32>
    %5 = arith.addf %2, %4 : vector<4x32xf32>
    %c0_5 = arith.constant 0 : index
    %c0_6 = arith.constant 0 : index
    %6 = vector.load %arg5[%c0_5, %c0_6] : memref<4x32xf32, #tpu.memory_space<vmem>>, vector<4x32xf32>
    tpu.vector_store %arg5[%c0_5, %c0_6], %5 {strides = array<i32>} : memref<4x32xf32, #tpu.memory_space<vmem>>, vector<4x32xf32>,
    %c0_7 = arith.constant 0 : index
    %c0_8 = arith.constant 0 : index
    %7 = vector.load %arg3[%c0_7, %c0_8] : memref<32x32xf32, #tpu.memory_space<vmem>>, vector<32x32xf32>
    %cst_9 = arith.constant dense<0.000000e+00> : vector<4x32xf32>
    %8 = tpu.matmul %0, %7, %cst_9 {dimension_numbers = #tpu.dot_dimension_numbers<[1], [0], [0], [1], [0, 0, 1, 1], [], []>} : vector<4x32xf32>, vector<32x32xf32>, vector<4x32xf32> -> vector<4x32xf32>
    %c0_10 = arith.constant 0 : index
    %c0_11 = arith.constant 0 : index
    %9 = vector.load %arg4[%c0_10, %c0_11] : memref<1x32xf32, #tpu.memory_space<vmem>>, vector<1x32xf32>
    %10 = vector.broadcast %9 : vector<1x32xf32> to vector<4x32xf32>
    %11 = arith.addf %8, %10 : vector<4x32xf32>
    %c0_12 = arith.constant 0 : index
    %c0_13 = arith.constant 0 : index
    %12 = vector.load %arg6[%c0_12, %c0_13] : memref<4x32xf32, #tpu.memory_space<vmem>>, vector<4x32xf32>
    tpu.vector_store %arg6[%c0_12, %c0_13], %11 {strides = array<i32>} : memref<4x32xf32, #tpu.memory_space<vmem>>, vector<4x32xf32>,
    return
  }
}

module attributes {stable_mosaic.version = 11 : i64} {
  func.func @_kl_sum_kernel(%arg0: memref<4x32xf32, #tpu.memory_space<vmem>>, %arg1: memref<4x32xf32, #tpu.memory_space<vmem>>, %arg2: memref<1x1xf32, #tpu.memory_space<vmem>>) attributes {dimension_semantics = [], scalar_prefetch = 0 : i64, scratch_operands = 0 : i64, tpu.core_type = #tpu.core_type<tc>} {
    %c0 = arith.constant 0 : index
    %c0_0 = arith.constant 0 : index
    %0 = vector.load %arg0[%c0, %c0_0] : memref<4x32xf32, #tpu.memory_space<vmem>>, vector<4x32xf32>
    %c0_1 = arith.constant 0 : index
    %c0_2 = arith.constant 0 : index
    %1 = vector.load %arg1[%c0_1, %c0_2] : memref<4x32xf32, #tpu.memory_space<vmem>>, vector<4x32xf32>
    %2 = arith.mulf %0, %0 : vector<4x32xf32>
    %3 = math.exp %1 : vector<4x32xf32>
    %4 = arith.addf %2, %3 : vector<4x32xf32>
    %5 = arith.subf %4, %1 : vector<4x32xf32>
    %cst = arith.constant 1.000000e+00 : f32
    %6 = vector.broadcast %cst : f32 to vector<4x32xf32>
    %7 = arith.subf %5, %6 : vector<4x32xf32>
    %cst_3 = arith.constant 5.000000e-01 : f32
    %8 = vector.broadcast %cst_3 : f32 to vector<4x32xf32>
    %9 = arith.mulf %7, %8 : vector<4x32xf32>
    %10 = vector.shape_cast %9 : vector<4x32xf32> to vector<1x4x32xf32>
    %cst_4 = arith.constant dense<0.000000e+00> : vector<1xf32>
    %11 = vector.multi_reduction <add>, %10, %cst_4 [1, 2] : vector<1x4x32xf32> to vector<1xf32>
    %12 = vector.shape_cast %11 : vector<1xf32> to vector<1x1x1xf32>
    %13 = vector.extract %12[0, 0, 0] : f32 from vector<1x1x1xf32>
    %14 = vector.broadcast %13 : f32 to vector<1x1xf32>
    %c0_5 = arith.constant 0 : index
    %c0_6 = arith.constant 0 : index
    %15 = vector.load %arg2[%c0_5, %c0_6] : memref<1x1xf32, #tpu.memory_space<vmem>>, vector<1x1xf32>
    tpu.vector_store %arg2[%c0_5, %c0_6], %14 {strides = array<i32>} : memref<1x1xf32, #tpu.memory_space<vmem>>, vector<1x1xf32>,
    return
  }
}

module attributes {stable_mosaic.version = 11 : i64} {
  func.func @_decoder_step_kernel(%arg0: i32, %arg1: memref<1x2x128xf32, #tpu.memory_space<vmem>>, %arg2: memref<1x2x1xf32, #tpu.memory_space<vmem>>, %arg3: memref<1x2x32xf32, #tpu.memory_space<vmem>>, %arg4: memref<2x32xf32, #tpu.memory_space<vmem>>, %arg5: memref<2x8x32xf32, #tpu.memory_space<vmem>>, %arg6: memref<2x1x8xf32, #tpu.memory_space<vmem>>, %arg7: memref<32x128xf32, #tpu.memory_space<vmem>>, %arg8: memref<32x32xf32, #tpu.memory_space<vmem>>, %arg9: memref<1x32xf32, #tpu.memory_space<vmem>>, %arg10: memref<1x2x32xf32, #tpu.memory_space<vmem>>, %arg11: memref<1x2x32xf32, #tpu.memory_space<vmem>>, %arg12: memref<1x1xf32, #tpu.memory_space<vmem>>, %arg13: memref<2x32xf32, #tpu.memory_space<vmem>>, %arg14: memref<2x32xf32, #tpu.memory_space<vmem>>) attributes {dimension_semantics = [#tpu.dimension_semantics<arbitrary>], iteration_bounds = array<i64: 8>, scalar_prefetch = 0 : i64, scratch_operands = 2 : i64, tpu.core_type = #tpu.core_type<tc>, window_params = [{transform_indices = @transform_0, window_bounds = array<i64: 1, 2, 128>}, {transform_indices = @transform_1, window_bounds = array<i64: 1, 2, 1>}, {transform_indices = @transform_2, window_bounds = array<i64: 1, 2, 32>}, {pipeline_mode = #tpu.pipeline_mode<synchronous>, transform_indices = @transform_3, window_bounds = array<i64: 2, 32>}, {pipeline_mode = #tpu.pipeline_mode<synchronous>, transform_indices = @transform_4, window_bounds = array<i64: 2, 8, 32>}, {pipeline_mode = #tpu.pipeline_mode<synchronous>, transform_indices = @transform_5, window_bounds = array<i64: 2, 1, 8>}, {pipeline_mode = #tpu.pipeline_mode<synchronous>, transform_indices = @transform_6, window_bounds = array<i64: 32, 128>}, {pipeline_mode = #tpu.pipeline_mode<synchronous>, transform_indices = @transform_7, window_bounds = array<i64: 32, 32>}, {pipeline_mode = #tpu.pipeline_mode<synchronous>, transform_indices = @transform_8, window_bounds = array<i64: 1, 32>}, {transform_indices = @transform_9, window_bounds = array<i64: 1, 2, 32>}, {transform_indices = @transform_10, window_bounds = array<i64: 1, 2, 32>}, {pipeline_mode = #tpu.pipeline_mode<synchronous>, transform_indices = @transform_11, window_bounds = array<i64: 1, 1>}]} {
    %c0_i32 = arith.constant 0 : i32
    %0 = arith.cmpi eq, %arg0, %c0_i32 : i32
    %1 = arith.extui %0 : i1 to i32
    %c0_i32_0 = arith.constant 0 : i32
    %2 = arith.cmpi ne, %1, %c0_i32_0 : i32
    scf.if %2 {
      %c0_54 = arith.constant 0 : index
      %c0_55 = arith.constant 0 : index
      %106 = vector.load %arg4[%c0_54, %c0_55] : memref<2x32xf32, #tpu.memory_space<vmem>>, vector<2x32xf32>
      %c0_56 = arith.constant 0 : index
      %c0_57 = arith.constant 0 : index
      %107 = vector.load %arg13[%c0_56, %c0_57] : memref<2x32xf32, #tpu.memory_space<vmem>>, vector<2x32xf32>
      tpu.vector_store %arg13[%c0_56, %c0_57], %106 {strides = array<i32>} : memref<2x32xf32, #tpu.memory_space<vmem>>, vector<2x32xf32>,
      %cst_58 = arith.constant 0.000000e+00 : f32
      %108 = vector.broadcast %cst_58 : f32 to vector<2x32xf32>
      %c0_59 = arith.constant 0 : index
      %c0_60 = arith.constant 0 : index
      %109 = vector.load %arg14[%c0_59, %c0_60] : memref<2x32xf32, #tpu.memory_space<vmem>>, vector<2x32xf32>
      tpu.vector_store %arg14[%c0_59, %c0_60], %108 {strides = array<i32>} : memref<2x32xf32, #tpu.memory_space<vmem>>, vector<2x32xf32>,
      %cst_61 = arith.constant 0.000000e+00 : f32
      %110 = vector.broadcast %cst_61 : f32 to vector<1x1xf32>
      %c0_62 = arith.constant 0 : index
      %c0_63 = arith.constant 0 : index
      %111 = vector.load %arg12[%c0_62, %c0_63] : memref<1x1xf32, #tpu.memory_space<vmem>>, vector<1x1xf32>
      tpu.vector_store %arg12[%c0_62, %c0_63], %110 {strides = array<i32>} : memref<1x1xf32, #tpu.memory_space<vmem>>, vector<1x1xf32>,
    } else {
    }
    %c0 = arith.constant 0 : index
    %c0_1 = arith.constant 0 : index
    %3 = vector.load %arg13[%c0, %c0_1] : memref<2x32xf32, #tpu.memory_space<vmem>>, vector<2x32xf32>
    %c0_2 = arith.constant 0 : index
    %c0_3 = arith.constant 0 : index
    %4 = vector.load %arg14[%c0_2, %c0_3] : memref<2x32xf32, #tpu.memory_space<vmem>>, vector<2x32xf32>
    %c0_4 = arith.constant 0 : index
    %c0_5 = arith.constant 0 : index
    %c0_6 = arith.constant 0 : index
    %5 = vector.load %arg1[%c0_4, %c0_5, %c0_6] : memref<1x2x128xf32, #tpu.memory_space<vmem>>, vector<1x2x128xf32>
    %6 = vector.shape_cast %5 : vector<1x2x128xf32> to vector<2x128xf32>
    %c0_7 = arith.constant 0 : index
    %c0_8 = arith.constant 0 : index
    %7 = vector.load %arg7[%c0_7, %c0_8] : memref<32x128xf32, #tpu.memory_space<vmem>>, vector<32x128xf32>
    %cst = arith.constant dense<0.000000e+00> : vector<2x128xf32>
    %8 = tpu.matmul %3, %7, %cst {dimension_numbers = #tpu.dot_dimension_numbers<[1], [0], [0], [1], [0, 0, 1, 1], [], []>} : vector<2x32xf32>, vector<32x128xf32>, vector<2x128xf32> -> vector<2x128xf32>
    %9 = arith.addf %6, %8 : vector<2x128xf32>
    %10 = vector.extract_strided_slice %9 {offsets = [0, 0], sizes = [2, 32], strides = [1, 1]} : vector<2x128xf32> to vector<2x32xf32>
    %11 = arith.negf %10 : vector<2x32xf32>
    %12 = math.exp %11 : vector<2x32xf32>
    %cst_9 = arith.constant 1.000000e+00 : f32
    %13 = vector.broadcast %cst_9 : f32 to vector<2x32xf32>
    %14 = arith.addf %13, %12 : vector<2x32xf32>
    %15 = arith.divf %13, %14 : vector<2x32xf32>
    %16 = vector.extract_strided_slice %9 {offsets = [0, 32], sizes = [2, 32], strides = [1, 1]} : vector<2x128xf32> to vector<2x32xf32>
    %17 = arith.negf %16 : vector<2x32xf32>
    %18 = math.exp %17 : vector<2x32xf32>
    %cst_10 = arith.constant 1.000000e+00 : f32
    %19 = vector.broadcast %cst_10 : f32 to vector<2x32xf32>
    %20 = arith.addf %19, %18 : vector<2x32xf32>
    %21 = arith.divf %19, %20 : vector<2x32xf32>
    %22 = vector.extract_strided_slice %9 {offsets = [0, 64], sizes = [2, 32], strides = [1, 1]} : vector<2x128xf32> to vector<2x32xf32>
    %23 = math.tanh %22 : vector<2x32xf32>
    %24 = vector.extract_strided_slice %9 {offsets = [0, 96], sizes = [2, 32], strides = [1, 1]} : vector<2x128xf32> to vector<2x32xf32>
    %25 = arith.negf %24 : vector<2x32xf32>
    %26 = math.exp %25 : vector<2x32xf32>
    %cst_11 = arith.constant 1.000000e+00 : f32
    %27 = vector.broadcast %cst_11 : f32 to vector<2x32xf32>
    %28 = arith.addf %27, %26 : vector<2x32xf32>
    %29 = arith.divf %27, %28 : vector<2x32xf32>
    %30 = arith.mulf %21, %4 : vector<2x32xf32>
    %31 = arith.mulf %15, %23 : vector<2x32xf32>
    %32 = arith.addf %30, %31 : vector<2x32xf32>
    %33 = math.tanh %32 : vector<2x32xf32>
    %34 = arith.mulf %29, %33 : vector<2x32xf32>
    %c0_12 = arith.constant 0 : index
    %c0_13 = arith.constant 0 : index
    %c0_14 = arith.constant 0 : index
    %35 = vector.load %arg2[%c0_12, %c0_13, %c0_14] : memref<1x2x1xf32, #tpu.memory_space<vmem>>, vector<1x2x1xf32>
    %36 = vector.shape_cast %35 : vector<1x2x1xf32> to vector<2x1xf32>
    %37 = vector.broadcast %36 : vector<2x1xf32> to vector<2x32xf32>
    %38 = arith.mulf %37, %34 : vector<2x32xf32>
    %cst_15 = arith.constant 1.000000e+00 : f32
    %39 = vector.broadcast %cst_15 : f32 to vector<2x1xf32>
    %40 = arith.subf %39, %36 : vector<2x1xf32>
    %41 = vector.broadcast %40 : vector<2x1xf32> to vector<2x32xf32>
    %42 = arith.mulf %41, %3 : vector<2x32xf32>
    %43 = arith.addf %38, %42 : vector<2x32xf32>
    %44 = vector.broadcast %36 : vector<2x1xf32> to vector<2x32xf32>
    %45 = arith.mulf %44, %32 : vector<2x32xf32>
    %cst_16 = arith.constant 1.000000e+00 : f32
    %46 = vector.broadcast %cst_16 : f32 to vector<2x1xf32>
    %47 = arith.subf %46, %36 : vector<2x1xf32>
    %48 = vector.broadcast %47 : vector<2x1xf32> to vector<2x32xf32>
    %49 = arith.mulf %48, %4 : vector<2x32xf32>
    %50 = arith.addf %45, %49 : vector<2x32xf32>
    %c0_17 = arith.constant 0 : index
    %c0_18 = arith.constant 0 : index
    %51 = vector.load %arg13[%c0_17, %c0_18] : memref<2x32xf32, #tpu.memory_space<vmem>>, vector<2x32xf32>
    tpu.vector_store %arg13[%c0_17, %c0_18], %43 {strides = array<i32>} : memref<2x32xf32, #tpu.memory_space<vmem>>, vector<2x32xf32>,
    %c0_19 = arith.constant 0 : index
    %c0_20 = arith.constant 0 : index
    %52 = vector.load %arg14[%c0_19, %c0_20] : memref<2x32xf32, #tpu.memory_space<vmem>>, vector<2x32xf32>
    tpu.vector_store %arg14[%c0_19, %c0_20], %50 {strides = array<i32>} : memref<2x32xf32, #tpu.memory_space<vmem>>, vector<2x32xf32>,
    %c0_21 = arith.constant 0 : index
    %c0_22 = arith.constant 0 : index
    %c0_23 = arith.constant 0 : index
    %53 = vector.load %arg10[%c0_21, %c0_22, %c0_23] : memref<1x2x32xf32, #tpu.memory_space<vmem>>, vector<1x2x32xf32>
    %54 = vector.shape_cast %53 : vector<1x2x32xf32> to vector<2x32xf32>
    %55 = vector.shape_cast %43 : vector<2x32xf32> to vector<1x2x32xf32>
    tpu.vector_store %arg10[%c0_21, %c0_22, %c0_23], %55 {strides = array<i32>} : memref<1x2x32xf32, #tpu.memory_space<vmem>>, vector<1x2x32xf32>,
    %c0_24 = arith.constant 0 : index
    %c0_25 = arith.constant 0 : index
    %c0_26 = arith.constant 0 : index
    %56 = vector.load %arg5[%c0_24, %c0_25, %c0_26] : memref<2x8x32xf32, #tpu.memory_space<vmem>>, vector<2x8x32xf32>
    %57 = vector.shape_cast %43 : vector<2x32xf32> to vector<2x1x32xf32>
    "tpu.trace_start"() <{level = 10 : i32, message = "bkd,bsd->bks"}> : () -> ()
    %cst_27 = arith.constant dense<0.000000e+00> : vector<2x1x8xf32>
    %58 = tpu.matmul %57, %56, %cst_27 {dimension_numbers = #tpu.dot_dimension_numbers<[2], [2], [1], [1], [0, 0, 0, 1, 1, 1], [0], [0]>} : vector<2x1x32xf32>, vector<2x8x32xf32>, vector<2x1x8xf32> -> vector<2x1x8xf32>
    "tpu.trace_stop"() : () -> ()
    %c0_28 = arith.constant 0 : index
    %c0_29 = arith.constant 0 : index
    %c0_30 = arith.constant 0 : index
    %59 = vector.load %arg6[%c0_28, %c0_29, %c0_30] : memref<2x1x8xf32, #tpu.memory_space<vmem>>, vector<2x1x8xf32>
    %cst_31 = arith.constant 5.000000e-01 : f32
    %60 = vector.broadcast %cst_31 : f32 to vector<2x1x8xf32>
    %61 = arith.cmpf ogt, %59, %60 : vector<2x1x8xf32>
    %cst_32 = arith.constant -1.000000e+06 : f32
    %62 = vector.broadcast %cst_32 : f32 to vector<2x1x8xf32>
    %63 = arith.select %61, %58, %62 : vector<2x1x8xi1>, vector<2x1x8xf32>
    %cst_33 = arith.constant dense<0xFF800000> : vector<2x1xf32>
    %64 = vector.multi_reduction <maximumf>, %63, %cst_33 [2] : vector<2x1x8xf32> to vector<2x1xf32>
    %65 = vector.shape_cast %64 : vector<2x1xf32> to vector<2x1x1xf32>
    %66 = vector.broadcast %65 : vector<2x1x1xf32> to vector<2x1x8xf32>
    %67 = arith.subf %63, %66 : vector<2x1x8xf32>
    %68 = math.exp %67 : vector<2x1x8xf32>
    %cst_34 = arith.constant dense<0.000000e+00> : vector<2x1xf32>
    %69 = vector.multi_reduction <add>, %68, %cst_34 [2] : vector<2x1x8xf32> to vector<2x1xf32>
    %70 = vector.shape_cast %69 : vector<2x1xf32> to vector<2x1x1xf32>
    %71 = tpu.reciprocal %70 {approx = true} : vector<2x1x1xf32> -> vector<2x1x1xf32>
    %72 = vector.broadcast %71 : vector<2x1x1xf32> to vector<2x1x8xf32>
    %73 = arith.mulf %68, %72 : vector<2x1x8xf32>
    "tpu.trace_start"() <{level = 10 : i32, message = "bks,bsd->bkd"}> : () -> ()
    %cst_35 = arith.constant dense<0.000000e+00> : vector<2x1x32xf32>
    %74 = tpu.matmul %73, %56, %cst_35 {dimension_numbers = #tpu.dot_dimension_numbers<[2], [1], [1], [2], [0, 0, 0, 1, 1, 2], [0], [0]>} : vector<2x1x8xf32>, vector<2x8x32xf32>, vector<2x1x32xf32> -> vector<2x1x32xf32>
    "tpu.trace_stop"() : () -> ()
    %75 = vector.shape_cast %74 : vector<2x1x32xf32> to vector<2x32xf32>
    %76 = math.tanh %75 : vector<2x32xf32>
    %c0_36 = arith.constant 0 : index
    %c0_37 = arith.constant 0 : index
    %77 = vector.load %arg8[%c0_36, %c0_37] : memref<32x32xf32, #tpu.memory_space<vmem>>, vector<32x32xf32>
    %cst_38 = arith.constant dense<0.000000e+00> : vector<2x32xf32>
    %78 = tpu.matmul %76, %77, %cst_38 {dimension_numbers = #tpu.dot_dimension_numbers<[1], [0], [0], [1], [0, 0, 1, 1], [], []>} : vector<2x32xf32>, vector<32x32xf32>, vector<2x32xf32> -> vector<2x32xf32>
    %c0_39 = arith.constant 0 : index
    %c0_40 = arith.constant 0 : index
    %79 = vector.load %arg9[%c0_39, %c0_40] : memref<1x32xf32, #tpu.memory_space<vmem>>, vector<1x32xf32>
    %80 = vector.broadcast %79 : vector<1x32xf32> to vector<2x32xf32>
    %81 = arith.addf %78, %80 : vector<2x32xf32>
    %82 = math.exp %81 : vector<2x32xf32>
    %c0_41 = arith.constant 0 : index
    %c0_42 = arith.constant 0 : index
    %c0_43 = arith.constant 0 : index
    %83 = vector.load %arg3[%c0_41, %c0_42, %c0_43] : memref<1x2x32xf32, #tpu.memory_space<vmem>>, vector<1x2x32xf32>
    %84 = vector.shape_cast %83 : vector<1x2x32xf32> to vector<2x32xf32>
    %85 = arith.mulf %82, %84 : vector<2x32xf32>
    %86 = arith.addf %75, %85 : vector<2x32xf32>
    %c0_44 = arith.constant 0 : index
    %c0_45 = arith.constant 0 : index
    %c0_46 = arith.constant 0 : index
    %87 = vector.load %arg11[%c0_44, %c0_45, %c0_46] : memref<1x2x32xf32, #tpu.memory_space<vmem>>, vector<1x2x32xf32>
    %88 = vector.shape_cast %87 : vector<1x2x32xf32> to vector<2x32xf32>
    %89 = vector.shape_cast %86 : vector<2x32xf32> to vector<1x2x32xf32>
    tpu.vector_store %arg11[%c0_44, %c0_45, %c0_46], %89 {strides = array<i32>} : memref<1x2x32xf32, #tpu.memory_space<vmem>>, vector<1x2x32xf32>,
    %c0_47 = arith.constant 0 : index
    %c0_48 = arith.constant 0 : index
    %90 = vector.load %arg12[%c0_47, %c0_48] : memref<1x1xf32, #tpu.memory_space<vmem>>, vector<1x1xf32>
    %91 = arith.mulf %75, %75 : vector<2x32xf32>
    %92 = math.exp %82 : vector<2x32xf32>
    %93 = arith.addf %91, %92 : vector<2x32xf32>
    %94 = arith.subf %93, %82 : vector<2x32xf32>
    %cst_49 = arith.constant 1.000000e+00 : f32
    %95 = vector.broadcast %cst_49 : f32 to vector<2x32xf32>
    %96 = arith.subf %94, %95 : vector<2x32xf32>
    %cst_50 = arith.constant 5.000000e-01 : f32
    %97 = vector.broadcast %cst_50 : f32 to vector<2x32xf32>
    %98 = arith.mulf %96, %97 : vector<2x32xf32>
    %99 = vector.shape_cast %98 : vector<2x32xf32> to vector<1x2x32xf32>
    %cst_51 = arith.constant dense<0.000000e+00> : vector<1xf32>
    %100 = vector.multi_reduction <add>, %99, %cst_51 [1, 2] : vector<1x2x32xf32> to vector<1xf32>
    %101 = vector.shape_cast %100 : vector<1xf32> to vector<1x1x1xf32>
    %102 = vector.extract %101[0, 0, 0] : f32 from vector<1x1x1xf32>
    %103 = vector.broadcast %102 : f32 to vector<1x1xf32>
    %104 = arith.addf %90, %103 : vector<1x1xf32>
    %c0_52 = arith.constant 0 : index
    %c0_53 = arith.constant 0 : index
    %105 = vector.load %arg12[%c0_52, %c0_53] : memref<1x1xf32, #tpu.memory_space<vmem>>, vector<1x1xf32>
    tpu.vector_store %arg12[%c0_52, %c0_53], %104 {strides = array<i32>} : memref<1x1xf32, #tpu.memory_space<vmem>>, vector<1x1xf32>,
    return
  }
  func.func @transform_0(%arg0: i32) -> (i32, i32, i32) {
    %c0_i32 = arith.constant 0 : i32
    %c0_i32_0 = arith.constant 0 : i32
    %c0_i32_1 = arith.constant 0 : i32
    return %arg0, %c0_i32, %c0_i32_0 : i32, i32, i32
  }
  func.func @transform_1(%arg0: i32) -> (i32, i32, i32) {
    %c0_i32 = arith.constant 0 : i32
    %c0_i32_0 = arith.constant 0 : i32
    %c0_i32_1 = arith.constant 0 : i32
    return %arg0, %c0_i32, %c0_i32_0 : i32, i32, i32
  }
  func.func @transform_2(%arg0: i32) -> (i32, i32, i32) {
    %c0_i32 = arith.constant 0 : i32
    %c0_i32_0 = arith.constant 0 : i32
    %c0_i32_1 = arith.constant 0 : i32
    return %arg0, %c0_i32, %c0_i32_0 : i32, i32, i32
  }
  func.func @transform_3(%arg0: i32) -> (i32, i32) {
    %c0_i32 = arith.constant 0 : i32
    %c0_i32_0 = arith.constant 0 : i32
    %c0_i32_1 = arith.constant 0 : i32
    return %c0_i32, %c0_i32_0 : i32, i32
  }
  func.func @transform_4(%arg0: i32) -> (i32, i32, i32) {
    %c0_i32 = arith.constant 0 : i32
    %c0_i32_0 = arith.constant 0 : i32
    %c0_i32_1 = arith.constant 0 : i32
    %c0_i32_2 = arith.constant 0 : i32
    return %c0_i32, %c0_i32_0, %c0_i32_1 : i32, i32, i32
  }
  func.func @transform_5(%arg0: i32) -> (i32, i32, i32) {
    %c0_i32 = arith.constant 0 : i32
    %c0_i32_0 = arith.constant 0 : i32
    %c0_i32_1 = arith.constant 0 : i32
    %c0_i32_2 = arith.constant 0 : i32
    return %c0_i32, %c0_i32_0, %c0_i32_1 : i32, i32, i32
  }
  func.func @transform_6(%arg0: i32) -> (i32, i32) {
    %c0_i32 = arith.constant 0 : i32
    %c0_i32_0 = arith.constant 0 : i32
    %c0_i32_1 = arith.constant 0 : i32
    return %c0_i32, %c0_i32_0 : i32, i32
  }
  func.func @transform_7(%arg0: i32) -> (i32, i32) {
    %c0_i32 = arith.constant 0 : i32
    %c0_i32_0 = arith.constant 0 : i32
    %c0_i32_1 = arith.constant 0 : i32
    return %c0_i32, %c0_i32_0 : i32, i32
  }
  func.func @transform_8(%arg0: i32) -> (i32, i32) {
    %c0_i32 = arith.constant 0 : i32
    %c0_i32_0 = arith.constant 0 : i32
    %c0_i32_1 = arith.constant 0 : i32
    return %c0_i32, %c0_i32_0 : i32, i32
  }
  func.func @transform_9(%arg0: i32) -> (i32, i32, i32) {
    %c0_i32 = arith.constant 0 : i32
    %c0_i32_0 = arith.constant 0 : i32
    %c0_i32_1 = arith.constant 0 : i32
    return %arg0, %c0_i32, %c0_i32_0 : i32, i32, i32
  }
  func.func @transform_10(%arg0: i32) -> (i32, i32, i32) {
    %c0_i32 = arith.constant 0 : i32
    %c0_i32_0 = arith.constant 0 : i32
    %c0_i32_1 = arith.constant 0 : i32
    return %arg0, %c0_i32, %c0_i32_0 : i32, i32, i32
  }
  func.func @transform_11(%arg0: i32) -> (i32, i32) {
    %c0_i32 = arith.constant 0 : i32
    %c0_i32_0 = arith.constant 0 : i32
    %c0_i32_1 = arith.constant 0 : i32
    return %c0_i32, %c0_i32_0 : i32, i32
  }
}

module attributes {stable_mosaic.version = 11 : i64} {
  func.func @_head_ce_kernel(%arg0: i32, %arg1: memref<16x32xf32, #tpu.memory_space<vmem>>, %arg2: memref<16x32xf32, #tpu.memory_space<vmem>>, %arg3: memref<16x1xi32, #tpu.memory_space<vmem>>, %arg4: memref<16x1xf32, #tpu.memory_space<vmem>>, %arg5: memref<32x32xf32, #tpu.memory_space<vmem>>, %arg6: memref<32x32xf32, #tpu.memory_space<vmem>>, %arg7: memref<32x32xf32, #tpu.memory_space<vmem>>, %arg8: memref<32x32xf32, #tpu.memory_space<vmem>>, %arg9: memref<1x32xf32, #tpu.memory_space<vmem>>, %arg10: memref<1x32xf32, #tpu.memory_space<vmem>>, %arg11: memref<32x48xf32, #tpu.memory_space<vmem>>, %arg12: memref<1x48xf32, #tpu.memory_space<vmem>>, %arg13: memref<1x1xf32, #tpu.memory_space<vmem>>) attributes {dimension_semantics = [#tpu.dimension_semantics<arbitrary>], iteration_bounds = array<i64: 1>, scalar_prefetch = 0 : i64, scratch_operands = 0 : i64, tpu.core_type = #tpu.core_type<tc>, window_params = [{transform_indices = @transform_0, window_bounds = array<i64: 16, 32>}, {transform_indices = @transform_1, window_bounds = array<i64: 16, 32>}, {transform_indices = @transform_2, window_bounds = array<i64: 16, 1>}, {transform_indices = @transform_3, window_bounds = array<i64: 16, 1>}, {pipeline_mode = #tpu.pipeline_mode<synchronous>, transform_indices = @transform_4, window_bounds = array<i64: 32, 32>}, {pipeline_mode = #tpu.pipeline_mode<synchronous>, transform_indices = @transform_5, window_bounds = array<i64: 32, 32>}, {pipeline_mode = #tpu.pipeline_mode<synchronous>, transform_indices = @transform_6, window_bounds = array<i64: 32, 32>}, {pipeline_mode = #tpu.pipeline_mode<synchronous>, transform_indices = @transform_7, window_bounds = array<i64: 32, 32>}, {pipeline_mode = #tpu.pipeline_mode<synchronous>, transform_indices = @transform_8, window_bounds = array<i64: 1, 32>}, {pipeline_mode = #tpu.pipeline_mode<synchronous>, transform_indices = @transform_9, window_bounds = array<i64: 1, 32>}, {pipeline_mode = #tpu.pipeline_mode<synchronous>, transform_indices = @transform_10, window_bounds = array<i64: 32, 48>}, {pipeline_mode = #tpu.pipeline_mode<synchronous>, transform_indices = @transform_11, window_bounds = array<i64: 1, 48>}, {pipeline_mode = #tpu.pipeline_mode<synchronous>, transform_indices = @transform_12, window_bounds = array<i64: 1, 1>}]} {
    %c0_i32 = arith.constant 0 : i32
    %0 = arith.cmpi eq, %arg0, %c0_i32 : i32
    %1 = arith.extui %0 : i1 to i32
    %c0_i32_0 = arith.constant 0 : i32
    %2 = arith.cmpi ne, %1, %c0_i32_0 : i32
    scf.if %2 {
      %cst_37 = arith.constant 0.000000e+00 : f32
      %55 = vector.broadcast %cst_37 : f32 to vector<1x1xf32>
      %c0_38 = arith.constant 0 : index
      %c0_39 = arith.constant 0 : index
      %56 = vector.load %arg13[%c0_38, %c0_39] : memref<1x1xf32, #tpu.memory_space<vmem>>, vector<1x1xf32>
      tpu.vector_store %arg13[%c0_38, %c0_39], %55 {strides = array<i32>} : memref<1x1xf32, #tpu.memory_space<vmem>>, vector<1x1xf32>,
    } else {
    }
    %c0 = arith.constant 0 : index
    %c0_1 = arith.constant 0 : index
    %3 = vector.load %arg1[%c0, %c0_1] : memref<16x32xf32, #tpu.memory_space<vmem>>, vector<16x32xf32>
    %c0_2 = arith.constant 0 : index
    %c0_3 = arith.constant 0 : index
    %4 = vector.load %arg2[%c0_2, %c0_3] : memref<16x32xf32, #tpu.memory_space<vmem>>, vector<16x32xf32>
    %c0_4 = arith.constant 0 : index
    %c0_5 = arith.constant 0 : index
    %5 = vector.load %arg5[%c0_4, %c0_5] : memref<32x32xf32, #tpu.memory_space<vmem>>, vector<32x32xf32>
    %cst = arith.constant dense<0.000000e+00> : vector<16x32xf32>
    %6 = tpu.matmul %3, %5, %cst {dimension_numbers = #tpu.dot_dimension_numbers<[1], [0], [0], [1], [0, 0, 1, 1], [], []>} : vector<16x32xf32>, vector<32x32xf32>, vector<16x32xf32> -> vector<16x32xf32>
    %c0_6 = arith.constant 0 : index
    %c0_7 = arith.constant 0 : index
    %7 = vector.load %arg6[%c0_6, %c0_7] : memref<32x32xf32, #tpu.memory_space<vmem>>, vector<32x32xf32>
    %cst_8 = arith.constant dense<0.000000e+00> : vector<16x32xf32>
    %8 = tpu.matmul %4, %7, %cst_8 {dimension_numbers = #tpu.dot_dimension_numbers<[1], [0], [0], [1], [0, 0, 1, 1], [], []>} : vector<16x32xf32>, vector<32x32xf32>, vector<16x32xf32> -> vector<16x32xf32>
    %9 = arith.addf %6, %8 : vector<16x32xf32>
    %c0_9 = arith.constant 0 : index
    %c0_10 = arith.constant 0 : index
    %10 = vector.load %arg9[%c0_9, %c0_10] : memref<1x32xf32, #tpu.memory_space<vmem>>, vector<1x32xf32>
    %11 = vector.broadcast %10 : vector<1x32xf32> to vector<16x32xf32>
    %12 = arith.addf %9, %11 : vector<16x32xf32>
    %c0_11 = arith.constant 0 : index
    %c0_12 = arith.constant 0 : index
    %13 = vector.load %arg7[%c0_11, %c0_12] : memref<32x32xf32, #tpu.memory_space<vmem>>, vector<32x32xf32>
    %cst_13 = arith.constant dense<0.000000e+00> : vector<16x32xf32>
    %14 = tpu.matmul %3, %13, %cst_13 {dimension_numbers = #tpu.dot_dimension_numbers<[1], [0], [0], [1], [0, 0, 1, 1], [], []>} : vector<16x32xf32>, vector<32x32xf32>, vector<16x32xf32> -> vector<16x32xf32>
    %c0_14 = arith.constant 0 : index
    %c0_15 = arith.constant 0 : index
    %15 = vector.load %arg8[%c0_14, %c0_15] : memref<32x32xf32, #tpu.memory_space<vmem>>, vector<32x32xf32>
    %cst_16 = arith.constant dense<0.000000e+00> : vector<16x32xf32>
    %16 = tpu.matmul %4, %15, %cst_16 {dimension_numbers = #tpu.dot_dimension_numbers<[1], [0], [0], [1], [0, 0, 1, 1], [], []>} : vector<16x32xf32>, vector<32x32xf32>, vector<16x32xf32> -> vector<16x32xf32>
    %17 = arith.addf %14, %16 : vector<16x32xf32>
    %c0_17 = arith.constant 0 : index
    %c0_18 = arith.constant 0 : index
    %18 = vector.load %arg10[%c0_17, %c0_18] : memref<1x32xf32, #tpu.memory_space<vmem>>, vector<1x32xf32>
    %19 = vector.broadcast %18 : vector<1x32xf32> to vector<16x32xf32>
    %20 = arith.addf %17, %19 : vector<16x32xf32>
    %21 = arith.maximumf %12, %20 : vector<16x32xf32>
    %c0_19 = arith.constant 0 : index
    %c0_20 = arith.constant 0 : index
    %22 = vector.load %arg11[%c0_19, %c0_20] : memref<32x48xf32, #tpu.memory_space<vmem>>, vector<32x48xf32>
    %cst_21 = arith.constant dense<0.000000e+00> : vector<16x48xf32>
    %23 = tpu.matmul %21, %22, %cst_21 {dimension_numbers = #tpu.dot_dimension_numbers<[1], [0], [0], [1], [0, 0, 1, 1], [], []>} : vector<16x32xf32>, vector<32x48xf32>, vector<16x48xf32> -> vector<16x48xf32>
    %c0_22 = arith.constant 0 : index
    %c0_23 = arith.constant 0 : index
    %24 = vector.load %arg12[%c0_22, %c0_23] : memref<1x48xf32, #tpu.memory_space<vmem>>, vector<1x48xf32>
    %25 = vector.broadcast %24 : vector<1x48xf32> to vector<16x48xf32>
    %26 = arith.addf %23, %25 : vector<16x48xf32>
    %cst_24 = arith.constant dense<0xFF800000> : vector<16xf32>
    %27 = vector.multi_reduction <maximumf>, %26, %cst_24 [1] : vector<16x48xf32> to vector<16xf32>
    %28 = vector.shape_cast %27 : vector<16xf32> to vector<16x1xf32>
    %29 = vector.broadcast %28 : vector<16x1xf32> to vector<16x48xf32>
    %30 = arith.subf %26, %29 : vector<16x48xf32>
    %31 = math.exp %30 : vector<16x48xf32>
    %cst_25 = arith.constant dense<0.000000e+00> : vector<16xf32>
    %32 = vector.multi_reduction <add>, %31, %cst_25 [1] : vector<16x48xf32> to vector<16xf32>
    %33 = vector.shape_cast %32 : vector<16xf32> to vector<16x1xf32>
    %34 = math.log %33 : vector<16x1xf32>
    %35 = arith.addf %34, %28 : vector<16x1xf32>
    %36 = tpu.iota {dimensions = array<i32: 1>} : vector<16x48xi32>
    %c0_26 = arith.constant 0 : index
    %c0_27 = arith.constant 0 : index
    %37 = vector.load %arg3[%c0_26, %c0_27] : memref<16x1xi32, #tpu.memory_space<vmem>>, vector<16x1xi32>
    %38 = vector.broadcast %37 : vector<16x1xi32> to vector<16x48xi32>
    %39 = arith.cmpi eq, %36, %38 : vector<16x48xi32>
    %cst_28 = arith.constant 0.000000e+00 : f32
    %40 = vector.broadcast %cst_28 : f32 to vector<16x48xf32>
    %41 = arith.select %39, %26, %40 : vector<16x48xi1>, vector<16x48xf32>
    %cst_29 = arith.constant dense<0.000000e+00> : vector<16xf32>
    %42 = vector.multi_reduction <add>, %41, %cst_29 [1] : vector<16x48xf32> to vector<16xf32>
    %43 = vector.shape_cast %42 : vector<16xf32> to vector<16x1xf32>
    %c0_30 = arith.constant 0 : index
    %c0_31 = arith.constant 0 : index
    %44 = vector.load %arg13[%c0_30, %c0_31] : memref<1x1xf32, #tpu.memory_space<vmem>>, vector<1x1xf32>
    %45 = arith.subf %35, %43 : vector<16x1xf32>
    %c0_32 = arith.constant 0 : index
    %c0_33 = arith.constant 0 : index
    %46 = vector.load %arg4[%c0_32, %c0_33] : memref<16x1xf32, #tpu.memory_space<vmem>>, vector<16x1xf32>
    %47 = arith.mulf %45, %46 : vector<16x1xf32>
    %48 = vector.shape_cast %47 : vector<16x1xf32> to vector<1x16x1xf32>
    %cst_34 = arith.constant dense<0.000000e+00> : vector<1xf32>
    %49 = vector.multi_reduction <add>, %48, %cst_34 [1, 2] : vector<1x16x1xf32> to vector<1xf32>
    %50 = vector.shape_cast %49 : vector<1xf32> to vector<1x1x1xf32>
    %51 = vector.extract %50[0, 0, 0] : f32 from vector<1x1x1xf32>
    %52 = vector.broadcast %51 : f32 to vector<1x1xf32>
    %53 = arith.addf %44, %52 : vector<1x1xf32>
    %c0_35 = arith.constant 0 : index
    %c0_36 = arith.constant 0 : index
    %54 = vector.load %arg13[%c0_35, %c0_36] : memref<1x1xf32, #tpu.memory_space<vmem>>, vector<1x1xf32>
    tpu.vector_store %arg13[%c0_35, %c0_36], %53 {strides = array<i32>} : memref<1x1xf32, #tpu.memory_space<vmem>>, vector<1x1xf32>,
    return
  }
  func.func @transform_0(%arg0: i32) -> (i32, i32) {
    %c0_i32 = arith.constant 0 : i32
    %c0_i32_0 = arith.constant 0 : i32
    return %arg0, %c0_i32 : i32, i32
  }
  func.func @transform_1(%arg0: i32) -> (i32, i32) {
    %c0_i32 = arith.constant 0 : i32
    %c0_i32_0 = arith.constant 0 : i32
    return %arg0, %c0_i32 : i32, i32
  }
  func.func @transform_2(%arg0: i32) -> (i32, i32) {
    %c0_i32 = arith.constant 0 : i32
    %c0_i32_0 = arith.constant 0 : i32
    return %arg0, %c0_i32 : i32, i32
  }
  func.func @transform_3(%arg0: i32) -> (i32, i32) {
    %c0_i32 = arith.constant 0 : i32
    %c0_i32_0 = arith.constant 0 : i32
    return %arg0, %c0_i32 : i32, i32
  }
  func.func @transform_4(%arg0: i32) -> (i32, i32) {
    %c0_i32 = arith.constant 0 : i32
    %c0_i32_0 = arith.constant 0 : i32
    %c0_i32_1 = arith.constant 0 : i32
    return %c0_i32, %c0_i32_0 : i32, i32
  }
  func.func @transform_5(%arg0: i32) -> (i32, i32) {
    %c0_i32 = arith.constant 0 : i32
    %c0_i32_0 = arith.constant 0 : i32
    %c0_i32_1 = arith.constant 0 : i32
    return %c0_i32, %c0_i32_0 : i32, i32
  }
  func.func @transform_6(%arg0: i32) -> (i32, i32) {
    %c0_i32 = arith.constant 0 : i32
    %c0_i32_0 = arith.constant 0 : i32
    %c0_i32_1 = arith.constant 0 : i32
    return %c0_i32, %c0_i32_0 : i32, i32
  }
  func.func @transform_7(%arg0: i32) -> (i32, i32) {
    %c0_i32 = arith.constant 0 : i32
    %c0_i32_0 = arith.constant 0 : i32
    %c0_i32_1 = arith.constant 0 : i32
    return %c0_i32, %c0_i32_0 : i32, i32
  }
  func.func @transform_8(%arg0: i32) -> (i32, i32) {
    %c0_i32 = arith.constant 0 : i32
    %c0_i32_0 = arith.constant 0 : i32
    %c0_i32_1 = arith.constant 0 : i32
    return %c0_i32, %c0_i32_0 : i32, i32
  }
  func.func @transform_9(%arg0: i32) -> (i32, i32) {
    %c0_i32 = arith.constant 0 : i32
    %c0_i32_0 = arith.constant 0 : i32
    %c0_i32_1 = arith.constant 0 : i32
    return %c0_i32, %c0_i32_0 : i32, i32
  }
  func.func @transform_10(%arg0: i32) -> (i32, i32) {
    %c0_i32 = arith.constant 0 : i32
    %c0_i32_0 = arith.constant 0 : i32
    %c0_i32_1 = arith.constant 0 : i32
    return %c0_i32, %c0_i32_0 : i32, i32
  }
  func.func @transform_11(%arg0: i32) -> (i32, i32) {
    %c0_i32 = arith.constant 0 : i32
    %c0_i32_0 = arith.constant 0 : i32
    %c0_i32_1 = arith.constant 0 : i32
    return %c0_i32, %c0_i32_0 : i32, i32
  }
  func.func @transform_12(%arg0: i32) -> (i32, i32) {
    %c0_i32 = arith.constant 0 : i32
    %c0_i32_0 = arith.constant 0 : i32
    %c0_i32_1 = arith.constant 0 : i32
    return %c0_i32, %c0_i32_0 : i32, i32
  }
}

</mosaic_0001>

<bundles_post_ra>
// kernel: variational_seq2seq_forward.12
= control target key start
LH: loop header
LB: loop body
LE: loop exit
PB: predicated region body
PF: predicated region fallthrough
CT: control target
= control target key end

     0   :  { %vm27_vm0 = vcmask 261120   ;;  %s184_s1 = inlined_call_operand.vmem [shape: f32[32,128], index: 1, kind: input, shape index: {}]   ;;  %s185_s0 = inlined_call_operand.vmem [shape: f32[16,32], index: 0, kind: input, shape index: {}]   ;;  %s186_s2 = inlined_call_operand.vmem [shape: f32[1,128], index: 2, kind: input, shape index: {}]   ;;  %s187_s3 = inlined_call_operand.vmem [shape: f32[16,128], index: 3, kind: output, shape index: {}]  }
   0x1   :  { %v19_v0 = vld [vmem:[%s184_s1 + $0x18] sm:$0xff]  ;;  %v18_v1 = vld [vmem:[%s184_s1 + $0x10] sm:$0xff]  ;;  %v14_v2 = vld [vmem:[%s185_s0] sm:$0xff] }
   0x2   :  { %124 = vmatprep.subr.mxu0 %v19_v0  ;;  %v17_v3 = vld [vmem:[%s184_s1 + $0x8] sm:$0xff]  ;;  %132 = vmatprep.mubr.msk.f32.mxu0 %vm27_vm0, %v14_v2  ;;  %v16_v4 = vld [vmem:[%s184_s1] sm:$0xff] }
   0x3   :  { %125 = vmatpush3.msra.mxu0 %v19_v0  ;;  %v15_v5 = vld [vmem:[%s185_s0 + $0x8] sm:$0xff]  ;;  %v115_v6 = vld [vmem:[%s186_s2] ss:$0 sm:$0xff] }
   0x4   :  { %126 = vmatprep.subr.mxu0 %v18_v1 }
   0x5   :  { %127 = vmatpush3.msra.mxu0 %v18_v1 }
   0x6   :  { %128 = vmatprep.subr.mxu0 %v17_v3 }
   0x7   :  { %129 = vmatpush3.msra.mxu0 %v17_v3 }
   0x8   :  { %130 = vmatprep.subr.mxu0 %v16_v4 }
   0x9   :  { %131 = vmatpush3.msra.mxu0 %v16_v4 }
   0xa   :  { %133 = vmatmul.mubr.msk.f32.vlgmr.msra.gmra.mxu0 %vm27_vm0, %v15_v5 }
  0xca   :  { %v134_v7 = vpop.f32.mrf.mxu0 }
  0xcb   :  { %v106_v8 = vadd.f32 %v134_v7, %v115_v6 }
  0xcc   :  { %v100_v9 = vpop.f32.mrf.mxu0 }
  0xcd   :  { %110 = vst [vmem:[%s187_s3 + $0x8] sm:$0xff] %v106_v8  ;;  %v101_v10 = vadd.f32 %v115_v6, %v100_v9 }
  0xcf   :  { %109 = vst [vmem:[%s187_s3] sm:$0xff] %v101_v10 }

// kernel: variational_seq2seq_forward.10
= control target key start
LH: loop header
LB: loop body
LE: loop exit
PB: predicated region body
PF: predicated region fallthrough
CT: control target
= control target key end

     0   :  { %vm25_vm0 = vcmask 130048   ;;  %s168_s1 = inlined_call_operand.vmem [shape: f32[16,128], index: 1, kind: input, shape index: {}]   ;;  %s169_s0 = inlined_call_operand.vmem [shape: f32[16,16], index: 0, kind: input, shape index: {}]   ;;  %s170_s2 = inlined_call_operand.vmem [shape: f32[1,128], index: 2, kind: input, shape index: {}]   ;;  %s171_s3 = inlined_call_operand.vmem [shape: f32[16,128], index: 3, kind: output, shape index: {}]  }
   0x1   :  { %v17_v0 = vld [vmem:[%s168_s1 + $0x8] sm:$0xff]  ;;  %v16_v1 = vld [vmem:[%s168_s1] sm:$0xff] }
   0x2   :  { %v14_v2 = vld [vmem:[%s169_s0] sm:$0xff]  ;;  %120 = vmatprep.subr.mxu0 %v17_v0  ;;  %v15_v3 = vld [vmem:[%s169_s0 + $0x8] sm:$0xff] }
   0x3   :  { %124 = vmatprep.mubr.msk.f32.mxu0 %vm25_vm0, %v14_v2  ;;  %121 = vmatpush3.msra.mxu0 %v17_v0  ;;  %v113_v4 = vld [vmem:[%s170_s2] ss:$0 sm:$0xff] }
   0x4   :  { %122 = vmatprep.subr.mxu0 %v16_v1 }
   0x5   :  { %123 = vmatpush3.msra.mxu0 %v16_v1 }
   0x6   :  { %125 = vmatmul.mubr.msk.f32.vlgmr.msra.gmra.mxu0 %vm25_vm0, %v15_v3 }
  0xc6   :  { %v126_v5 = vpop.f32.mrf.mxu0 }
  0xc7   :  { %v104_v6 = vadd.f32 %v126_v5, %v113_v4 }
  0xc8   :  { %v98_v7 = vpop.f32.mrf.mxu0 }
  0xc9   :  { %108 = vst [vmem:[%s171_s3 + $0x8] sm:$0xff] %v104_v6  ;;  %v99_v8 = vadd.f32 %v113_v4, %v98_v7 }
  0xcb   :  { %107 = vst [vmem:[%s171_s3] sm:$0xff] %v99_v8 }

// kernel: variational_seq2seq_forward.14
= control target key start
LH: loop header
LB: loop body
LE: loop exit
PB: predicated region body
PF: predicated region fallthrough
CT: control target
= control target key end

     0   :  { %v238_v0 = vmov 0.0   ;;  %vm34_vm0 = vcmask 261120   ;;  %vm239_vm1 = vmmov 0   ;;  %vm108_vm2 = vcmask 257024   ;;  %s314_s1 = inlined_call_operand.vmem [shape: f32[32,32], index: 1, kind: input, shape index: {}]   ;;  %s315_s3 = inlined_call_operand.vmem [shape: f32[32,32], index: 3, kind: input, shape index: {}]   ;;  %s316_s0 = inlined_call_operand.vmem [shape: f32[4,32], index: 0, kind: input, shape index: {}]   ;;  %s317_s2 = inlined_call_operand.vmem [shape: f32[1,32], index: 2, kind: input, shape index: {}]   ;;  %s318_s4 = inlined_call_operand.vmem [shape: f32[1,32], index: 4, kind: input, shape index: {}]   ;;  %s319_s5 = inlined_call_operand.vmem [shape: f32[4,32], index: 5, kind: output, shape index: {0}]   ;;  %s320_s6 = inlined_call_operand.vmem [shape: f32[4,32], index: 6, kind: output, shape index: {1}]  }
   0x1   :  { %214 = vmatprep.subr.mxu0 %v238_v0  ;;  %225 = vmatprep.subr.mxu1 %v238_v0  ;;  %v26_v1 = vld [vmem:[%s314_s1 + $0x18] sm:$0xff]  ;;  %v25_v3 = vld [vmem:[%s314_s1 + $0x10] sm:$0xff]  ;;  %v24_v5 = vld [vmem:[%s314_s1 + $0x8] sm:$0xff] }
   0x2   :  { %v113_v2 = vld [vmem:[%s315_s3 + $0x18] sm:$0xff]  ;;  %215 = vmatpush3.msra.mxu0 %v26_v1  ;;  %v112_v4 = vld [vmem:[%s315_s3 + $0x10] sm:$0xff]  ;;  %v111_v6 = vld [vmem:[%s315_s3 + $0x8] sm:$0xff]  ;;  %222 = vmatprep.mubr.msk.f32.mxu0 %vm239_vm1, %v238_v0 }
   0x3   :  { %226 = vmatpush3.msra.mxu1 %v113_v2  ;;  %216 = vmatprep.subr.mxu0 %v238_v0  ;;  %v23_v7 = vld [vmem:[%s314_s1] sm:$0xff] }
   0x4   :  { %227 = vmatprep.subr.mxu1 %v238_v0  ;;  %217 = vmatpush3.msra.mxu0 %v25_v3  ;;  %v110_v8 = vld [vmem:[%s315_s3] sm:$0xff] }
   0x5   :  { %228 = vmatpush3.msra.mxu1 %v112_v4  ;;  %218 = vmatprep.subr.mxu0 %v238_v0  ;;  %v22_v9 = vld [vmem:[%s316_s0] sm:$0xf] }
   0x6   :  { %229 = vmatprep.subr.mxu1 %v238_v0  ;;  %219 = vmatpush3.msra.mxu0 %v24_v5  ;;  %v200_v10 = vld [vmem:[%s317_s2] ss:$0 sm:$0xff] }
   0x7   :  { %230 = vmatpush3.msra.mxu1 %v111_v6  ;;  %220 = vmatprep.subr.mxu0 %v238_v0  ;;  %v202_v11 = vld [vmem:[%s318_s4] ss:$0 sm:$0xff] }
   0x8   :  { %231 = vmatprep.subr.mxu1 %v238_v0  ;;  %221 = vmatpush3.msra.mxu0 %v23_v7 }
   0x9   :  { %232 = vmatpush3.msra.mxu1 %v110_v8  ;;  %233 = vmatprep.mubr.msk.f32.mxu1 %vm239_vm1, %v238_v0 }
   0xa   :  { %223 = vmatmul.mubr.msk.f32.vlgmr.msra.gmra.mxu0 %vm34_vm0, %v22_v9  ;;  %234 = vmatmul.mubr.msk.f32.vlgmr.msra.gmra.mxu1 %vm34_vm0, %v22_v9 }
  0xca   :  { %v104_v12 = vpop.f32.mrf.mxu0  ;;  %v187_v13 = vpop.f32.mrf.mxu1 }
  0xcb   :  { %v105_v14 = vadd.f32 %v200_v10, %v104_v12  ;;  %v188_v15 = vadd.f32 %v202_v11, %v187_v13 }
  0xcc   :  { %v224_v16 = vpop.f32.mrf.mxu0  ;;  %v235_v17 = vpop.f32.mrf.mxu1 }
  0xcd   :  { %109 = vst.msk [vmem:[%s319_s5] sm:$0xf] %vm108_vm2, %v105_v14  ;;  %191 = vst.msk [vmem:[%s320_s6] sm:$0xf] %vm108_vm2, %v188_v15 }

// kernel: variational_seq2seq_forward.11
= control target key start
LH: loop header
LB: loop body
LE: loop exit
PB: predicated region body
PF: predicated region fallthrough
CT: control target
= control target key end

     0   :  { %s720_s18 = smov 0   ;;  %s771_s0 = inlined_call_operand.vmem [shape: f32[8,2,64], index: 0, kind: input, shape index: {}]   ;;  %s772_s1 = inlined_call_operand.vmem [shape: f32[8,2,64], index: 1, kind: input, shape index: {}]   ;;  %s773_s2 = inlined_call_operand.vmem [shape: f32[16,64], index: 2, kind: input, shape index: {}]   ;;  %s774_s3 = inlined_call_operand.vmem [shape: f32[16,64], index: 3, kind: input, shape index: {}]   ;;  %s775_s4 = inlined_call_operand.vmem [shape: f32[8,2,16], index: 4, kind: output, shape index: {0}]   ;;  %s776_s5 = inlined_call_operand.vmem [shape: f32[8,2,16], index: 5, kind: output, shape index: {1}]  }
   0x1 LB: > { %s606_s19 = sadd.s32 4294967295, %s680_s18   ;;  %p610_p0 = scmp.ge.s32.totalorder %s680_s18, 1  ;;  %s680_s18 = sphi %s720_s18, %s16_s18  }
   0x2   : > { %p204_p1 = scmp.lt.s32.totalorder %s680_s18, 9 }
   0x4   : > { %p205_p2 = pnand %p610_p0, %p204_p1 }
   0x5   : > { %p240_p3 = scmp.lt.s32.totalorder (!%p205_p2), %s606_s19, 7  ;;  %s244_s20 = ssub.s32 (!%p205_p2), 7, %s606_s19 }
   0x6   : > { %208 = sbr.rel (%p205_p2) target bundleno = 720 (0x2d0), region = 36  ;;  %p245_p4 = scmp.lt.s32.totalorder (!%p205_p2), %s244_s20, 7 }
   0x7   : > { %p615_p5 = scmp.ne.s32.totalorder (!%p205_p2), %s606_s19, 0 }
   0xb   : > { %s241_s21 = scalar_select %p240_p3, %s606_s19, 7 }
   0xc   : > { %s778_s20 = smov (!%p245_p4, %s244_s20), 7  ;;  %263 = sbr.rel (%p615_p5) target bundleno = 20 (0x14), region = 40 }
   0xd   : > { %s611_s22 = sshll.u32 %s241_s21, 1  ;;  %s612_s26 = sshll.u32 %s778_s20, 1 }
   0xe   : > { %s731_s25 = scalar_lea.vmem %s771_s0, %s611_s22  ;;  %s736_s29 = scalar_lea.vmem %s772_s1, %s612_s26 }
   0xf   : > { %s741_s7 = scalar_lea.vmem %s775_s4, %s611_s22  ;;  %s746_s10 = scalar_lea.vmem %s776_s5, %s612_s26 }
  0x11   : > { %vm264_vm0 = vcmask 123904   ;;  %v682_v0 = vmov 0.0  }
  0x12   : > { %265 = vst.msk [vmem:[#allocation2] sm:$0x3] %vm264_vm0, %v682_v0  ;;  %266 = vst.msk [vmem:[#allocation3] sm:$0x3] %vm264_vm0, %v682_v0 }
  0x13   : > { %267 = vst.msk [vmem:[#allocation4] sm:$0x3] %vm264_vm0, %v682_v0  ;;  %268 = vst.msk [vmem:[#allocation5] sm:$0x3] %vm264_vm0, %v682_v0 }
  0x14 PF: > { %v272_v1 = vld [vmem:[%s773_s2 + $0x8] sm:$0xff]  ;;  %v683_v3 = vmov 0.0   ;;  %v271_v4 = vld [vmem:[%s773_s2] sm:$0xff]  ;;  %vm684_vm1 = vmmov 0   ;;  %vm273_vm2 = vcmask 130048   ;;  %s685_s20 = smov 16  }
  0x15   : > { %v392_v2 = vld [vmem:[%s774_s3 + $0x8] sm:$0xff]  ;;  %628 = vmatprep.subr.mxu0 %v683_v3  ;;  %635 = vmatprep.subr.mxu1 %v683_v3  ;;  %v391_v6 = vld [vmem:[%s774_s3] sm:$0xff]  ;;  %s686_s21 = smov 96   ;;  %s687_s22 = smov 32   ;;  %vm381_vm3 = vcmask 123904  }
  0x16   : > { %629 = vmatpush3.msra.mxu0 %v272_v1  ;;  %632 = vmatprep.mubr.msk.f32.mxu0 %vm684_vm1, %v683_v3  ;;  %v269_v10 = vld [vmem:[%s731_s25] sm:$0x3]  ;;  %s688_s23 = smov 112   ;;  %s689_s24 = smov 80  }
  0x17   : > { %630 = vmatprep.subr.mxu0 %v683_v3  ;;  %636 = vmatpush3.msra.mxu1 %v392_v2  ;;  %v389_v12 = vld [vmem:[%s736_s29] sm:$0x3] }
  0x18   : > { %631 = vmatpush3.msra.mxu0 %v271_v4  ;;  %637 = vmatprep.subr.mxu1 %v683_v3 }
  0x19   : > { %v270_v5 = vld [vmem:[#allocation2] sm:$0x3]  ;;  %v348_v7 = vld [vmem:[#allocation3] sm:$0x3]  ;;  %638 = vmatpush3.msra.mxu1 %v391_v6  ;;  %639 = vmatprep.mubr.msk.f32.mxu1 %vm684_vm1, %v683_v3 }
  0x1a   : > { %v390_v8 = vld [vmem:[#allocation4] sm:$0x3]  ;;  %633 = vmatmul.mubr.msk.f32.vlgmr.msra.gmra.mxu0 %vm273_vm2, %v270_v5  ;;  %357 = vrot.lane.b32.xlu1 %v348_v7, %s685_s20  ;;  %v467_v9 = vld [vmem:[#allocation5] sm:$0x3] }
  0x1b   : > { %640 = vmatmul.mubr.msk.f32.vlgmr.msra.gmra.mxu1 %vm273_vm2, %v390_v8 }
  0x1e   : > { %476 = vrot.lane.b32.xlu1 %v467_v9, %s685_s20 }
  0x8c   : > { %v358_v32 = vpop.permute.xlu1 %357 }
  0x90   : > { %v477_v34 = vpop.permute.xlu1 %476 }
  0xda   : > { %v343_v11 = vpop.f32.mrf.mxu0 }
  0xdb   : > { %v347_v13 = vadd.f32 %v343_v11, %v269_v10  ;;  %v462_v15 = vpop.f32.mrf.mxu1 }
  0xdc   : > { %v634_v14 = vpop.f32.mrf.mxu0  ;;  %v466_v16 = vadd.f32 %v462_v15, %v389_v12 }
  0xdd   : > { %658 = vtanh.f32 %v347_v13  ;;  %v641_v17 = vpop.f32.mrf.mxu1  ;;  %v617_v20 = vmul.f32 -1.442695, %v347_v13 }
  0xde   : > { %660 = vtanh.f32 %v466_v16  ;;  %v619_v21 = vmul.f32 -1.442695, %v466_v16 }
  0xdf   : > { %662 = vpow2.f32 %v617_v20 }
  0xe0   : > { %664 = vpow2.f32 %v619_v21 }
  0xea   : > { %v659_v18 = vpop.eup %658 }
  0xeb   : > { %362 = vrot.lane.b32.xlu0 %v659_v18, %s686_s21  ;;  %v661_v19 = vpop.eup %660 }
  0xec   : > { %v663_v22 = vpop.eup %662 }
  0xed   : > { %v352_v23 = vadd.f32 1.0, %v663_v22  ;;  %v665_v24 = vpop.eup %664 }
  0xee   : > { %v471_v25 = vadd.f32 1.0, %v665_v24 }
  0xef   : > { %481 = vrot.lane.b32.xlu0 %v661_v19, %s686_s21  ;;  %666 = vrcp.f32 %v352_v23 }
  0xf0   : > { %668 = vrcp.f32 %v471_v25 }
  0xfc   : > { %v667_v26 = vpop.eup %666 }
  0xfd   : > { %v669_v29 = vpop.eup %668  ;;  %v360_v33 = vmul.f32 %v667_v26, %v358_v32 }
  0xfe   : > { %v479_v37 = vmul.f32 %v669_v29, %v477_v34 }
 0x15d   : > { %v363_v27 = vpop.permute.xlu0 %362 }
 0x15e   : > { %v365_v28 = vmul.f32 %v667_v26, %v363_v27 }
 0x160   : > { %367 = vrot.lane.b32.xlu0 %v365_v28, %s685_s20 }
 0x161   : > { %v482_v30 = vpop.permute.xlu0 %481 }
 0x162   : > { %v484_v31 = vmul.f32 %v669_v29, %v482_v30 }
 0x164   : > { %486 = vrot.lane.b32.xlu1 %v484_v31, %s685_s20 }
 0x1d2   : > { %v368_v35 = vpop.permute.xlu0 %367 }
 0x1d3   : > { %v370_v36 = vadd.f32 %v368_v35, %v360_v33 }
 0x1d5   : > { %670 = vtanh.f32 %v370_v36 }
 0x1d6   : > { %v487_v38 = vpop.permute.xlu1 %486 }
 0x1d7   : > { %v489_v39 = vadd.f32 %v487_v38, %v479_v37 }
 0x1d9   : > { %672 = vtanh.f32 %v489_v39 }
 0x1e2   : > { %v671_v40 = vpop.eup %670 }
 0x1e3   : > { %373 = vrot.lane.b32.xlu0 %v671_v40, %s687_s22 }
 0x1e6   : > { %v673_v41 = vpop.eup %672 }
 0x1e7   : > { %492 = vrot.lane.b32.xlu1 %v673_v41, %s687_s22 }
 0x1eb   : > { %384 = vrot.lane.b32.xlu1 %v370_v36, %s688_s23 }
 0x1ef   : > { %502 = vrot.lane.b32.xlu1 %v489_v39, %s688_s23 }
 0x255   : > { %v374_v42 = vpop.permute.xlu0 %373 }
 0x256   : > { %v376_v43 = vmul.f32 %v667_v26, %v374_v42 }
 0x258   : > { %378 = vrot.lane.b32.xlu0 %v376_v43, %s689_s24 }
 0x259   : > { %v493_v44 = vpop.permute.xlu1 %492 }
 0x25a   : > { %v495_v45 = vmul.f32 %v669_v29, %v493_v44 }
 0x25c   : > { %497 = vrot.lane.b32.xlu0 %v495_v45, %s689_s24 }
 0x25d   : > { %v385_v46 = vpop.permute.xlu1 %384 }
 0x25e   : > { %387 = vst.msk [vmem:[#allocation3] sm:$0x3] %vm381_vm3, %v385_v46 }
 0x261   : > { %v503_v47 = vpop.permute.xlu1 %502 }
 0x262   : > { %505 = vst.msk [vmem:[#allocation5] sm:$0x3] %vm381_vm3, %v503_v47 }
 0x2ca   : > { %v379_v48 = vpop.permute.xlu0 %378 }
 0x2cb   : > { %382 = vst.msk [vmem:[#allocation2] sm:$0x3] %vm381_vm3, %v379_v48  ;;  %388 = vst.msk [vmem:[%s741_s7] sm:$0x3] %vm381_vm3, %v379_v48 }
 0x2ce   : > { %v498_v49 = vpop.permute.xlu0 %497 }
 0x2cf   : > { %500 = vst.msk [vmem:[#allocation4] sm:$0x3] %vm381_vm3, %v498_v49  ;;  %506 = vst.msk [vmem:[%s746_s10] sm:$0x3] %vm381_vm3, %v498_v49 }
 0x2d0 PF: > { %s16_s18 = sadd.s32 1, %s680_s18  }
 0x2d1   : > { %p13_p6 = scmp.ge.s32.totalorder %s16_s18, 10  }
 0x2d3   :  { %15 = sbr.rel (!%p13_p6) target bundleno = 1 (0x1), region = 85 }

// kernel: variational_seq2seq_forward.17
= control target key start
LH: loop header
LB: loop body
LE: loop exit
PB: predicated region body
PF: predicated region fallthrough
CT: control target
= control target key end

     0   :  { %s102_s0 = inlined_call_operand.vmem [shape: f32[4,32], index: 0, kind: input, shape index: {}]   ;;  %s103_s1 = inlined_call_operand.vmem [shape: f32[4,32], index: 1, kind: input, shape index: {}]   ;;  %s104_s2 = inlined_call_operand.hbm [shape: f32[1,1], index: 2, kind: output, shape index: {}]  }
   0x1   :  { %v13_v0 = vld [vmem:[%s103_s1] sm:$0xf] }
   0x2   :  { %v15_v1 = vmul.f32 1.442695, %v13_v0 }
   0x3   :  { %7 = vsyncpa [#allocation3], 0  ;;  %v12_v2 = vld [vmem:[%s102_s0] sm:$0xf]  ;;  %vm21_vm0 = vcmask 257024   ;;  %s77_s1 = smov [#allocation2]  }
   0x4   :  { %53 = vpow2.f32 %v15_v1  ;;  %v14_v3 = vmul.f32 %v12_v2, %v12_v2  ;;  %s41_s13 = sshll.u32 %s77_s1, 4  ;;  %vm33_vm1 = vcmask 0   ;;  %s42_s13 = int_to_ptr.vmem [resolvable:$true] %s41_s13 }
   0x5   :  { %s55_s14 = scalar_lea.vmem %s42_s13, 16  ;;  %s59_s15 = scalar_lea.vmem %s42_s13, 32 }
   0x6   :  { %p56_p0 = scmp.ne.s32.totalorder %s42_s13, %s55_s14  ;;  %p60_p1 = scmp.lt.s32.totalorder %s42_s13, %s42_s13 }
   0x7   :  { %p61_p2 = scmp.lt.s32.totalorder %s59_s15, %s55_s14 }
   0x9   :  { %p62_p3 = por %p61_p2, %p60_p1 }
   0xb   :  { %p63_p4 = pnand %p62_p3, %p56_p0 }
  0x11   :  { %v54_v4 = vpop.eup %53 }
  0x12   :  { %v17_v5 = vadd.f32 %v54_v4, %v14_v3 }
  0x14   :  { %v18_v6 = vsub.f32 %v17_v5, %v13_v0 }
  0x16   :  { %v49_v7 = vadd.f32 -1.0, %v18_v6 }
  0x18   :  { %v20_v8 = vmul.f32 0.5, %v49_v7 }
  0x1a   :  { %v22_v9 = vsel %vm21_vm0, %v20_v8, 0.0 }
  0x1b   :  { %23 = vadd.xlane.f32.xlu0 %v22_v9 }
  0xa4   :  { %v24_v10 = vpop.xlane.xlu0 %23 }
  0xa5   :  { %v25_v11 = vrot.slane %v24_v10, 4 }
  0xa7   :  { %v26_v12 = vadd.f32 %v25_v11, %v24_v10 }
  0xa9   :  { %v27_v13 = vrot.slane %v26_v12, 2 }
  0xab   :  { %v28_v14 = vadd.f32 %v27_v13, %v26_v12 }
  0xad   :  { %v29_v15 = vrot.slane %v28_v14, 1 }
  0xaf   :  { %v30_v16 = vadd.f32 %v29_v15, %v28_v14 }
  0xb1   :  { %50 = vpush %v30_v16 }
  0xe2   :  { %s51_s0 = spop %50 }
  0xe3   :  { %v32_v17 = vstv %s51_s0 }
  0xe4   :  { %34 = vst.msk [vmem:[#allocation2] sm:$0x1] %vm33_vm1, %v32_v17 }
  0xe5   :  { %66 = shalt.err (!%p63_p4)
}
  0xe6   :  { %44 = dma.vmem_to_hbm [thread:$0]  %s42_s13, 16, %s104_s2, [#allocation3]  }
  0xe7   :  { %75 = dma.done.wait [#allocation3], 16  }
  0xe8   :  { %76 = vsyncadd [#allocation3], 4294967280 }
  0xe9   :  { %48 = vsyncpa [#allocation3], 1 }

// kernel: variational_seq2seq_forward.16
= control target key start
LH: loop header
LB: loop body
LE: loop exit
PB: predicated region body
PF: predicated region fallthrough
CT: control target
= control target key end

     0   :  { %vm60_vm0 = vcmask 261120   ;;  %s893_s0 = inlined_call_operand.vmem [shape: f32[16,32], index: 0, kind: input, shape index: {}]   ;;  %s894_s1 = inlined_call_operand.vmem [shape: f32[16,32], index: 1, kind: input, shape index: {}]   ;;  %s895_s2 = inlined_call_operand.vmem [shape: s32[16,1], index: 2, kind: input, shape index: {}]   ;;  %s896_s3 = inlined_call_operand.vmem [shape: f32[16,1], index: 3, kind: input, shape index: {}]   ;;  %s897_s4 = inlined_call_operand.vmem [shape: f32[32,32], index: 4, kind: input, shape index: {}]   ;;  %s898_s5 = inlined_call_operand.vmem [shape: f32[32,32], index: 5, kind: input, shape index: {}]   ;;  %s899_s6 = inlined_call_operand.vmem [shape: f32[32,32], index: 6, kind: input, shape index: {}]   ;;  %s900_s7 = inlined_call_operand.vmem [shape: f32[32,32], index: 7, kind: input, shape index: {}]   ;;  %s901_s8 = inlined_call_operand.vmem [shape: f32[1,32], index: 8, kind: input, shape index: {}]   ;;  %s902_s9 = inlined_call_operand.vmem [shape: f32[1,32], index: 9, kind: input, shape index: {}]   ;;  %s903_s10 = inlined_call_operand.vmem [shape: f32[32,48], index: 10, kind: input, shape index: {}]   ;;  %s904_s11 = inlined_call_operand.vmem [shape: f32[1,48], index: 11, kind: input, shape index: {}]   ;;  %s905_s12 = inlined_call_operand.hbm [shape: f32[1,1], index: 12, kind: output, shape index: {}]  }
   0x1   :  { %v59_v0 = vld [vmem:[%s898_s5 + $0x18] sm:$0xff]  ;;  %v58_v2 = vld [vmem:[%s898_s5 + $0x10] sm:$0xff]  ;;  %v57_v4 = vld [vmem:[%s898_s5 + $0x8] sm:$0xff] }
   0x2   :  { %v55_v1 = vld [vmem:[%s897_s4 + $0x18] sm:$0xff]  ;;  %619 = vmatprep.subr.mxu0 %v59_v0  ;;  %v54_v3 = vld [vmem:[%s897_s4 + $0x10] sm:$0xff]  ;;  %v53_v5 = vld [vmem:[%s897_s4 + $0x8] sm:$0xff] }
   0x3   :  { %630 = vmatprep.subr.mxu1 %v55_v1  ;;  %620 = vmatpush3.msra.mxu0 %v59_v0  ;;  %v56_v6 = vld [vmem:[%s898_s5] sm:$0xff] }
   0x4   :  { %631 = vmatpush3.msra.mxu1 %v55_v1  ;;  %621 = vmatprep.subr.mxu0 %v58_v2  ;;  %v52_v7 = vld [vmem:[%s897_s4] sm:$0xff] }
   0x5   :  { %632 = vmatprep.subr.mxu1 %v54_v3  ;;  %622 = vmatpush3.msra.mxu0 %v58_v2  ;;  %v50_v8 = vld [vmem:[%s894_s1] sm:$0xff] }
   0x6   :  { %633 = vmatpush3.msra.mxu1 %v54_v3  ;;  %623 = vmatprep.subr.mxu0 %v57_v4  ;;  %v48_v9 = vld [vmem:[%s893_s0] sm:$0xff] }
   0x7   :  { %634 = vmatprep.subr.mxu1 %v53_v5  ;;  %624 = vmatpush3.msra.mxu0 %v57_v4 }
   0x8   :  { %635 = vmatpush3.msra.mxu1 %v53_v5 }
   0x9   :  { %17 = vsyncpa [#allocation3], 0  ;;  %625 = vmatprep.subr.mxu0 %v56_v6  ;;  %636 = vmatprep.subr.mxu1 %v52_v7  ;;  %v51_v10 = vld [vmem:[%s894_s1 + $0x8] sm:$0xff]  ;;  %v239_v12 = vld [vmem:[%s900_s7 + $0x18] sm:$0xff]  ;;  %v711_v25 = vmov 0   ;;  %vm493_vm1 = vcmask 392192   ;;  %v518_v60 = vlaneseq }
   0xa   :  { %v49_v11 = vld [vmem:[%s893_s0 + $0x8] sm:$0xff]  ;;  %626 = vmatpush3.msra.mxu0 %v56_v6  ;;  %627 = vmatprep.mubr.msk.f32.mxu0 %vm60_vm0, %v50_v8  ;;  %v235_v13 = vld [vmem:[%s899_s6 + $0x18] sm:$0xff]  ;;  %v238_v14 = vld [vmem:[%s900_s7 + $0x10] sm:$0xff]  ;;  %vm545_vm4 = vcmask 7168   ;;  %vm46_vm5 = vcmask 0  }
   0xb   :  { %637 = vmatpush3.msra.mxu1 %v52_v7  ;;  %638 = vmatprep.mubr.msk.f32.mxu1 %vm60_vm0, %v48_v9  ;;  %v234_v15 = vld [vmem:[%s899_s6 + $0x10] sm:$0xff]  ;;  %v237_v16 = vld [vmem:[%s900_s7 + $0x8] sm:$0xff]  ;;  %v236_v18 = vld [vmem:[%s900_s7] sm:$0xff]  ;;  %v519_v62 = vand.u32 127, %v518_v60 }
   0xc   :  { %628 = vmatmul.mubr.msk.f32.vlgmr.msra.gmra.mxu0 %vm60_vm0, %v51_v10  ;;  %639 = vmatmul.mubr.msk.f32.vlgmr.msra.gmra.mxu1 %vm60_vm0, %v49_v11  ;;  %v233_v17 = vld [vmem:[%s899_s6 + $0x8] sm:$0xff]  ;;  %v232_v19 = vld [vmem:[%s899_s6] sm:$0xff]  ;;  %v404_v20 = vld [vmem:[%s903_s10 + $0x18] sm:$0xff] }
   0xd   :  { %641 = vmatprep.subr.mxu0 %v239_v12  ;;  %652 = vmatprep.subr.mxu1 %v235_v13  ;;  %v403_v21 = vld [vmem:[%s903_s10 + $0x10] sm:$0xff]  ;;  %v402_v22 = vld [vmem:[%s903_s10 + $0x8] sm:$0xff]  ;;  %v401_v23 = vld [vmem:[%s903_s10] sm:$0xff] }
   0xe   :  { %642 = vmatpush3.msra.mxu0 %v239_v12  ;;  %653 = vmatpush3.msra.mxu1 %v235_v13  ;;  %v520_v24 = vld [vmem:[%s895_s2] sm:$0xff]  ;;  %v521_v26 = vld [vmem:[%s895_s2 + $0x8] sm:$0xff] }
   0xf   :  { %643 = vmatprep.subr.mxu0 %v238_v14  ;;  %654 = vmatprep.subr.mxu1 %v234_v15  ;;  %v585_v35 = vld [vmem:[%s902_s9] ss:$0 sm:$0xff] }
  0x10   :  { %644 = vmatpush3.msra.mxu0 %v238_v14  ;;  %655 = vmatpush3.msra.mxu1 %v234_v15  ;;  %v580_v37 = vld [vmem:[%s901_s8] ss:$0 sm:$0xff] }
  0x11   :  { %645 = vmatprep.subr.mxu0 %v237_v16  ;;  %656 = vmatprep.subr.mxu1 %v233_v17  ;;  %v586_v48 = vld [vmem:[%s904_s11] ss:$0 sm:$0xff] }
  0x12   :  { %646 = vmatpush3.msra.mxu0 %v237_v16  ;;  %657 = vmatpush3.msra.mxu1 %v233_v17  ;;  %v541_v17 = vld [vmem:[%s896_s3] sm:$0xff] }
  0x13   :  { %647 = vmatprep.subr.mxu0 %v236_v18  ;;  %658 = vmatprep.subr.mxu1 %v232_v19 }
  0x14   :  { %648 = vmatpush3.msra.mxu0 %v236_v18  ;;  %649 = vmatprep.mubr.msk.f32.mxu0 %vm60_vm0, %v50_v8 }
  0x15   :  { %659 = vmatpush3.msra.mxu1 %v232_v19  ;;  %660 = vmatprep.mubr.msk.f32.mxu1 %vm60_vm0, %v48_v9  ;;  %v542_v19 = vld [vmem:[%s896_s3 + $0x8] sm:$0xff]  ;;  %s713_s3 = smov [#allocation2]  }
  0x16   :  { %650 = vmatmul.mubr.msk.f32.vlgmr.msra.gmra.mxu0 %vm60_vm0, %v51_v10  ;;  %661 = vmatmul.mubr.msk.f32.vlgmr.msra.gmra.mxu1 %vm60_vm0, %v49_v11  ;;  %s568_s14 = sshll.u32 %s713_s3, 4  ;;  %s569_s14 = int_to_ptr.vmem [resolvable:$true] %s568_s14 }
  0x17   :  { %663 = vmatprep.subr.mxu0 %v404_v20  ;;  %679 = vset.pattern.permute.xlu1 %v711_v25  ;;  %s689_s16 = scalar_lea.vmem %s569_s14, 16  ;;  %s693_s17 = scalar_lea.vmem %s569_s14, 32 }
  0x18   :  { %664 = vmatpush3.msra.mxu0 %v404_v20  ;;  %680 = vset.pattern.permute.xlu0 %v711_v25  ;;  %p690_p0 = scmp.ne.s32.totalorder %s569_s14, %s689_s16  ;;  %p694_p1 = scmp.lt.s32.totalorder %s569_s14, %s569_s14 }
  0x19   :  { %665 = vmatprep.subr.mxu0 %v403_v21  ;;  %523 = vperm.xlu1 %679, %v520_v24   ;;  %p695_p2 = scmp.lt.s32.totalorder %s693_s17, %s689_s16 }
  0x1a   :  { %666 = vmatpush3.msra.mxu0 %v403_v21 }
  0x1b   :  { %667 = vmatprep.subr.mxu0 %v402_v22  ;;  %p696_p3 = por %p695_p2, %p694_p1 }
  0x1c   :  { %668 = vmatpush3.msra.mxu0 %v402_v22 }
  0x1d   :  { %669 = vmatprep.subr.mxu0 %v401_v23  ;;  %526 = vperm.xlu1 %679, %v521_v26   ;;  %p697_p4 = pnand %p696_p3, %p690_p0 }
  0x1e   :  { %670 = vmatpush3.msra.mxu0 %v401_v23 }
  0x94   :  { %v524_v61 = vpop.permute.xlu1 %523 }
  0x95   :  { %vm528_vm2 = vcmp.eq.s32.totalorder %v519_v62, %v524_v61 }
  0x98   :  { %v527_v0 = vpop.permute.xlu1 %526 }
  0x99   :  { %vm529_vm3 = vcmp.eq.s32.totalorder %v519_v62, %v527_v0 }
  0xcc   :  { %v629_v27 = vpop.f32.mrf.mxu0  ;;  %v640_v28 = vpop.f32.mrf.mxu1 }
  0xcd   :  { %v220_v36 = vadd.f32 %v640_v28, %v629_v27  ;;  %v712_v27 = vmov 0.0  }
  0xce   :  { %v133_v29 = vpop.f32.mrf.mxu0  ;;  %v214_v30 = vpop.f32.mrf.mxu1  ;;  %47 = vst.msk [vmem:[#allocation2] sm:$0x1] %vm46_vm5, %v712_v27 }
  0xcf   :  { %v215_v33 = vadd.f32 %v214_v30, %v133_v29  ;;  %v231_v44 = vadd.f32 %v580_v37, %v220_v36 }
  0xd1   :  { %v230_v42 = vadd.f32 %v580_v37, %v215_v33 }
  0xd6   :  { %v651_v31 = vpop.f32.mrf.mxu0  ;;  %v662_v32 = vpop.f32.mrf.mxu1 }
  0xd7   :  { %v387_v34 = vadd.f32 %v662_v32, %v651_v31 }
  0xd8   :  { %v306_v38 = vpop.f32.mrf.mxu0  ;;  %v381_v39 = vpop.f32.mrf.mxu1 }
  0xd9   :  { %v382_v40 = vadd.f32 %v381_v39, %v306_v38  ;;  %v398_v41 = vadd.f32 %v585_v35, %v387_v34 }
  0xdb   :  { %v397_v43 = vadd.f32 %v585_v35, %v382_v40  ;;  %v400_v46 = vmax.f32 %v231_v44, %v398_v41  ;;  %v538_v35 = vld [vmem:[#allocation2] sm:$0x1] }
  0xdd   :  { %v399_v45 = vmax.f32 %v230_v42, %v397_v43 }
  0xdf   :  { %671 = vmatprep.mubr.msk.f32.mxu0 %vm60_vm0, %v399_v45 }
  0xe0   :  { %672 = vmatmul.mubr.msk.f32.vlgmr.msra.gmra.mxu0 %vm60_vm0, %v400_v46 }
 0x1a0   :  { %v673_v47 = vpop.f32.mrf.mxu0 }
 0x1a1   :  { %v490_v51 = vadd.f32 %v673_v47, %v586_v48 }
 0x1a2   :  { %v484_v49 = vpop.f32.mrf.mxu0 }
 0x1a3   :  { %v485_v50 = vadd.f32 %v586_v48, %v484_v49  ;;  %v497_v53 = vsel %vm493_vm1, %v490_v51, -inf  ;;  %v531_v6 = vsel %vm529_vm3, %v490_v51, 0.0 }
 0x1a4   :  { %v535_v7 = vsel %vm493_vm1, %v531_v6, 0.0 }
 0x1a5   :  { %v494_v52 = vsel %vm493_vm1, %v485_v50, -inf  ;;  %v530_v2 = vsel %vm528_vm2, %v485_v50, 0.0 }
 0x1a6   :  { %495 = vmax.xlane.f32.xlu0 %v494_v52  ;;  %v532_v4 = vsel %vm493_vm1, %v530_v2, 0.0 }
 0x1aa   :  { %498 = vmax.xlane.f32.xlu0 %v497_v53 }
 0x22f   :  { %v496_v54 = vpop.xlane.xlu0 %495 }
 0x230   :  { %v500_v55 = vsub.f32 %v485_v50, %v496_v54 }
 0x232   :  { %v502_v56 = vmul.f32 1.442695, %v500_v55 }
 0x233   :  { %v499_v57 = vpop.xlane.xlu0 %498 }
 0x234   :  { %681 = vpow2.f32 %v502_v56  ;;  %v501_v58 = vsub.f32 %v490_v51, %v499_v57 }
 0x236   :  { %v504_v59 = vmul.f32 1.442695, %v501_v58 }
 0x238   :  { %683 = vpow2.f32 %v504_v59 }
 0x241   :  { %v682_v63 = vpop.eup %681 }
 0x242   :  { %v506_v1 = vsel %vm493_vm1, %v682_v63, 0.0 }
 0x243   :  { %507 = vadd.xlane.f32.xlu0 %v506_v1 }
 0x245   :  { %v684_v3 = vpop.eup %683 }
 0x246   :  { %v509_v5 = vsel %vm493_vm1, %v684_v3, 0.0 }
 0x247   :  { %533 = vadd.xlane.f32.xlu0 %v532_v4  ;;  %510 = vadd.xlane.f32.xlu1 %v509_v5 }
 0x24b   :  { %536 = vadd.xlane.f32.xlu0 %v535_v7 }
 0x2cc   :  { %v508_v8 = vpop.xlane.xlu0 %507 }
 0x2cd   :  { %685 = vlog2.f32 %v508_v8 }
 0x2d0   :  { %v511_v9 = vpop.xlane.xlu1 %510  ;;  %v534_v12 = vpop.xlane.xlu0 %533 }
 0x2d1   :  { %687 = vlog2.f32 %v511_v9 }
 0x2d4   :  { %v537_v20 = vpop.xlane.xlu0 %536 }
 0x2da   :  { %v686_v10 = vpop.eup %685 }
 0x2db   :  { %v513_v11 = vmul.f32 0.6931472, %v686_v10 }
 0x2dd   :  { %v516_v13 = vadd.f32 %v513_v11, %v496_v54 }
 0x2de   :  { %v688_v14 = vpop.eup %687 }
 0x2df   :  { %v515_v15 = vmul.f32 0.6931472, %v688_v14  ;;  %v539_v16 = vsub.f32 %v516_v13, %v534_v12 }
 0x2e1   :  { %v517_v18 = vadd.f32 %v515_v15, %v499_v57  ;;  %v543_v21 = vmul.f32 %v541_v17, %v539_v16 }
 0x2e3   :  { %v540_v22 = vsub.f32 %v517_v18, %v537_v20  ;;  %v546_v24 = vsel %vm545_vm4, %v543_v21, 0.0 }
 0x2e5   :  { %v544_v23 = vmul.f32 %v542_v19, %v540_v22 }
 0x2e7   :  { %v547_v25 = vsel %vm545_vm4, %v544_v23, 0.0 }
 0x2e8   :  { %v548_v26 = vadd.f32 %v547_v25, %v546_v24 }
 0x2ea   :  { %549 = vadd.xlane.f32.xlu0 %v548_v26 }
 0x373   :  { %v550_v28 = vpop.xlane.xlu0 %549 }
 0x374   :  { %v551_v29 = vrot.slane %v550_v28, 4 }
 0x376   :  { %v552_v30 = vadd.f32 %v551_v29, %v550_v28 }
 0x378   :  { %v553_v31 = vrot.slane %v552_v30, 2 }
 0x37a   :  { %v554_v32 = vadd.f32 %v553_v31, %v552_v30 }
 0x37c   :  { %v555_v33 = vrot.slane %v554_v32, 1 }
 0x37e   :  { %v556_v34 = vadd.f32 %v555_v33, %v554_v32 }
 0x380   :  { %674 = vpush %v556_v34 }
 0x3b1   :  { %s675_s15 = spop %674 }
 0x3b2   :  { %v558_v36 = vstv %s675_s15 }
 0x3b3   :  { %v559_v37 = vadd.f32 %v558_v36, %v538_v35 }
 0x3b5   :  { %561 = vst.msk [vmem:[#allocation2] sm:$0x1] %vm46_vm5, %v559_v37 }
 0x3b6   :  { %700 = shalt.err (!%p697_p4)
}
 0x3b7   :  { %571 = dma.vmem_to_hbm [thread:$0]  %s569_s14, 16, %s905_s12, [#allocation3]  }
 0x3b8   :  { %709 = dma.done.wait [#allocation3], 16  }
 0x3b9   :  { %710 = vsyncadd [#allocation3], 4294967280 }
 0x3ba   :  { %575 = vsyncpa [#allocation3], 1 }

// kernel: variational_seq2seq_forward.15
= control target key start
LH: loop header
LB: loop body
LE: loop exit
PB: predicated region body
PF: predicated region fallthrough
CT: control target
= control target key end

     0   :  { %17 = vsyncpa [#allocation5], 0  ;;  %s1466_s17 = smov 0   ;;  %s1653_s0 = inlined_call_operand.vmem [shape: f32[8,2,128], index: 0, kind: input, shape index: {}]   ;;  %s1654_s1 = inlined_call_operand.vmem [shape: f32[8,2,1], index: 1, kind: input, shape index: {}]   ;;  %s1655_s2 = inlined_call_operand.vmem [shape: f32[8,2,32], index: 2, kind: input, shape index: {}]   ;;  %s1656_s3 = inlined_call_operand.vmem [shape: f32[2,32], index: 3, kind: input, shape index: {}]   ;;  %s1657_s4 = inlined_call_operand.vmem [shape: f32[2,8,32], index: 4, kind: input, shape index: {}]   ;;  %s1658_s5 = inlined_call_operand.vmem [shape: f32[2,1,8], index: 5, kind: input, shape index: {}]   ;;  %s1659_s6 = inlined_call_operand.vmem [shape: f32[32,128], index: 6, kind: input, shape index: {}]   ;;  %s1660_s7 = inlined_call_operand.vmem [shape: f32[32,32], index: 7, kind: input, shape index: {}]   ;;  %s1661_s8 = inlined_call_operand.vmem [shape: f32[1,32], index: 8, kind: input, shape index: {}]   ;;  %s1662_s9 = inlined_call_operand.vmem [shape: f32[8,2,32], index: 9, kind: output, shape index: {0}]   ;;  %s1663_s10 = inlined_call_operand.vmem [shape: f32[8,2,32], index: 10, kind: output, shape index: {1}]   ;;  %s1664_s11 = inlined_call_operand.hbm [shape: f32[1,1], index: 11, kind: output, shape index: {2}]  }
   0x1 LB: > { %s1472_s18 = sadd.s32 4294967295, %s1395_s17   ;;  %p1227_p0 = scmp.ge.s32.totalorder %s1395_s17, 1  ;;  %s1395_s17 = sphi %s1466_s17, %s23_s17  }
   0x2   : > { %p355_p1 = scmp.lt.s32.totalorder %s1395_s17, 9 }
   0x4   : > { %p356_p2 = pnand %p1227_p0, %p355_p1 }
   0x5   : > { %p405_p3 = scmp.lt.s32.totalorder (!%p356_p2), %s1472_s18, 7  ;;  %p1233_p4 = scmp.ne.s32.totalorder (!%p356_p2), %s1472_s18, 0 }
   0x6   : > { %359 = sbr.rel (%p356_p2) target bundleno = 1897 (0x769), region = 56 }
   0xb   : > { %s406_s19 = scalar_select %p405_p3, %s1472_s18, 7 }
   0xc   : > { %428 = sbr.rel (%p1233_p4) target bundleno = 20 (0x14), region = 60 }
   0xd   : > { %s1478_s20 = sshll.u32 %s406_s19, 1 }
   0xe   : > { %s408_s23 = scalar_lea.vmem %s1653_s0, %s1478_s20  ;;  %s412_s26 = scalar_lea.vmem %s1654_s1, %s1478_s20 }
   0xf   : > { %s416_s29 = scalar_lea.vmem %s1655_s2, %s1478_s20  ;;  %s420_s13 = scalar_lea.vmem %s1662_s9, %s1478_s20 }
  0x10   : > { %s424_s16 = scalar_lea.vmem %s1663_s10, %s1478_s20 }
  0x11   : > { %v429_v0 = vld [vmem:[%s1656_s3] sm:$0x3]  ;;  %vm430_vm0 = vcmask 254976   ;;  %vm433_vm1 = vcmask 0   ;;  %v1397_v1 = vmov 0.0  }
  0x12   : > { %431 = vst.msk [vmem:[#allocation2] sm:$0x3] %vm430_vm0, %v429_v0  ;;  %432 = vst.msk [vmem:[#allocation3] sm:$0x3] %vm430_vm0, %v1397_v1 }
  0x13   : > { %434 = vst.msk [vmem:[#allocation4] sm:$0x1] %vm433_vm1, %v1397_v1 }
  0x14 PF: > { %v441_v2 = vld [vmem:[%s1659_s6 + $0x18] sm:$0xff]  ;;  %v1398_v3 = vmov 0.0   ;;  %v440_v4 = vld [vmem:[%s1659_s6 + $0x10] sm:$0xff]  ;;  %vm1399_vm2 = vmmov 0   ;;  %v439_v5 = vld [vmem:[%s1659_s6 + $0x8] sm:$0xff]  ;;  %vm442_vm3 = vcmask 261120   ;;  %v588_v33 = vlaneseq }
  0x15   : > { %1268 = vmatprep.subr.mxu0 %v1398_v3  ;;  %1276 = vmatprep.mubr.msk.f32.mxu0 %vm1399_vm2, %v1398_v3  ;;  %v438_v6 = vld [vmem:[%s1659_s6] sm:$0xff]  ;;  %v1400_v8 = vmov 0   ;;  %s1401_s21 = smov 64   ;;  %s1402_s22 = smov 32   ;;  %v1404_v31 = vmov 1966171168  }
  0x16   : > { %1269 = vmatpush3.msra.mxu0 %v441_v2  ;;  %1279 = vmatprep.subr.mxu1 %v1398_v3  ;;  %v437_v9 = vld [vmem:[%s408_s23] sm:$0x3]  ;;  %s1403_s27 = smov 96   ;;  %v586_v32 = vunpack.c.l.s4 %v1404_v31  ;;  %v589_v35 = vshrl.u32 %v588_v33, 7  ;;  %v584_v50 = vld [vmem:[%s1657_s4 + $0x8] sm:$0xff]  ;;  %vm775_vm5 = vcmask 57344  }
  0x17   : > { %1270 = vmatprep.subr.mxu0 %v1398_v3  ;;  %1281 = vmatprep.mubr.msk.f32.mxu1 %vm1399_vm2, %v1398_v3  ;;  %v545_v15 = vld [vmem:[%s412_s26] sm:$0x3]  ;;  %vm798_vm7 = vcmask 64512   ;;  %vm961_vm8 = vcmask 1041409   ;;  %vm575_vm9 = vcmask 254976   ;;  %vm1089_vm10 = vcmask 0  }
  0x18   : > { %1271 = vmatpush3.msra.mxu0 %v440_v4  ;;  %1336 = vset.pattern.permute.xlu0 %v1400_v8  ;;  %v552_v22 = vsub.f32 1.0, %v545_v15  ;;  %v583_v30 = vld [vmem:[%s1657_s4] sm:$0xff]  ;;  %v587_v34 = vunpack.c.0.s8 %v586_v32  ;;  %v609_v44 = vsub.s32 0, %v589_v35  ;;  %p1316_p5 = scmp.eq.s32.totalorder %s1472_s18, 7 }
  0x19   : > { %1272 = vmatprep.subr.mxu0 %v1398_v3  ;;  %v435_v7 = vld [vmem:[#allocation2] sm:$0x3]  ;;  %1335 = vset.pattern.permute.xlu1 %v1400_v8  ;;  %v1534_v14 = vld [vmem:[#allocation3] sm:$0x3] }
  0x1a   : > { %1273 = vmatpush3.msra.mxu0 %v439_v5  ;;  %1280 = vmatpush3.xpose.msk.msra.mxu1 %vm442_vm3, %v583_v30  ;;  %v590_v40 = vsub.s32 %v587_v34, %v589_v35  ;;  %v769_v53 = vld [vmem:[%s1658_s5] sm:$0x1]  ;;  %v770_v54 = vld [vmem:[%s1658_s5 + $0x1] sm:$0x1] }
  0x1b   : > { %1274 = vmatprep.subr.mxu0 %v1398_v3  ;;  %1284 = vmatprep.subr.mxu1 %v1398_v3  ;;  %vm771_vm4 = vcmp.gt.f32.partialorder %v769_v53, 0.5  ;;  %vm772_vm6 = vcmp.gt.f32.partialorder %v770_v54, 0.5  ;;  %v1037_v34 = vld [vmem:[%s416_s29] sm:$0x3] }
  0x1c   : > { %1275 = vmatpush3.msra.mxu0 %v438_v6 }
  0x1d   : > { %1277 = vmatmul.mubr.msk.f32.vlgmr.msra.gmra.mxu0 %vm442_vm3, %v435_v7  ;;  %1299 = vmatprep.subr.mxu0 %v1398_v3 }
  0x1e   : > { %1307 = vmatprep.mubr.msk.f32.mxu0 %vm1399_vm2, %v1398_v3 }
  0xdd   : > { %v512_v10 = vpop.f32.mrf.mxu0 }
  0xde   : > { %v516_v11 = vadd.f32 %v512_v10, %v437_v9 }
  0xdf   : > { %v1278_v12 = vpop.f32.mrf.mxu0 }
  0xe0   : > { %1337 = vtanh.f32 %v516_v11  ;;  %v1235_v16 = vmul.f32 -1.442695, %v516_v11 }
  0xe2   : > { %1339 = vpow2.f32 %v1235_v16 }
  0xed   : > { %v1338_v13 = vpop.eup %1337 }
  0xee   : > { %530 = vrot.lane.b32.xlu0 %v1338_v13, %s1401_s21 }
  0xef   : > { %v1340_v17 = vpop.eup %1339 }
  0xf0   : > { %v520_v18 = vadd.f32 1.0, %v1340_v17 }
  0xf2   : > { %525 = vrot.lane.b32.xlu0 %v1534_v14, %s1402_s22  ;;  %1341 = vrcp.f32 %v520_v18  ;;  %v949_v18 = vld [vmem:[%s1660_s7 + $0x10] sm:$0xff] }
  0xf6   : > { %548 = vperm.xlu0 %1336, %v545_v15  }
  0xff   : > { %v1342_v19 = vpop.eup %1341 }
 0x160   : > { %v531_v20 = vpop.permute.xlu0 %530 }
 0x161   : > { %v533_v21 = vmul.f32 %v1342_v19, %v531_v20  ;;  %v947_v20 = vld [vmem:[%s1660_s7] sm:$0xff] }
 0x163   : > { %535 = vrot.lane.b32.xlu1 %v533_v21, %s1402_s22 }
 0x164   : > { %v526_v23 = vpop.permute.xlu0 %525 }
 0x165   : > { %v528_v24 = vmul.f32 %v1342_v19, %v526_v23 }
 0x167   : > { %555 = vperm.xlu1 %1335, %v552_v22  }
 0x171   : > { %v1556_v38 = vpop.permute.xlu0 %548 }
 0x1d5   : > { %v536_v25 = vpop.permute.xlu1 %535 }
 0x1d6   : > { %v1544_v26 = vadd.f32 %v536_v25, %v528_v24 }
 0x1d8   : > { %1343 = vtanh.f32 %v1544_v26 }
 0x1e2   : > { %v1547_v27 = vpop.permute.xlu1 %555 }
 0x1e3   : > { %v558_v29 = vmul.f32 %v1547_v27, %v435_v7  ;;  %v565_v10 = vmul.f32 %v1547_v27, %v1534_v14  ;;  %v950_v14 = vld [vmem:[%s1660_s7 + $0x18] sm:$0xff] }
 0x1e4   : > { %1300 = vmatpush3.msra.mxu0 %v950_v14 }
 0x1e5   : > { %v1344_v28 = vpop.eup %1343  ;;  %1301 = vmatprep.subr.mxu0 %v1398_v3 }
 0x1e6   : > { %541 = vrot.lane.b32.xlu1 %v1344_v28, %s1401_s21  ;;  %1302 = vmatpush3.msra.mxu0 %v949_v18 }
 0x1e7   : > { %1303 = vmatprep.subr.mxu0 %v1398_v3 }
 0x1ea   : > { %560 = vrot.lane.b32.xlu1 %v558_v29, %s1403_s27 }
 0x258   : > { %v542_v36 = vpop.permute.xlu1 %541 }
 0x259   : > { %v544_v37 = vmul.f32 %v1342_v19, %v542_v36  ;;  %v948_v19 = vld [vmem:[%s1660_s7 + $0x8] sm:$0xff] }
 0x25a   : > { %1304 = vmatpush3.msra.mxu0 %v948_v19 }
 0x25b   : > { %v551_v39 = vmul.f32 %v1556_v38, %v544_v37  ;;  %1305 = vmatprep.subr.mxu0 %v1398_v3 }
 0x25c   : > { %v561_v41 = vpop.permute.xlu1 %560  ;;  %1306 = vmatpush3.msra.mxu0 %v947_v20 }
 0x25d   : > { %v1559_v42 = vadd.f32 %v561_v41, %v551_v39 }
 0x25f   : > { %v591_v43 = vrot.slane %v1559_v42, %v590_v40 }
 0x261   : > { %v592_v45 = vcombine.high %v591_v43, %v591_v43  ;;  %v599_v46 = vrot.slane %v591_v43, %v590_v40 }
 0x263   : > { %v610_v47 = vrot.slane %v599_v46, %v609_v44  ;;  %v606_v48 = vrot.slane %v592_v45, %v590_v40 }
 0x265   : > { %611 = vrot.lane.b32.xlu0 %v610_v47, %s1402_s22  ;;  %v691_v49 = vrot.slane %v606_v48, %v609_v44 }
 0x267   : > { %692 = vrot.lane.b32.xlu1 %v691_v49, %s1402_s22 }
 0x2d7   : > { %v612_v51 = vpop.permute.xlu0 %611 }
 0x2d8   : > { %1282 = vmatmul.mubr.msk.f32.vlgmr.msra.gmra.mxu1 %vm442_vm3, %v612_v51 }
 0x2d9   : > { %1285 = vmatpush3.xpose.msk.msra.mxu1 %vm442_vm3, %v584_v50  ;;  %1286 = vmatprep.mubr.msk.f32.mxu1 %vm1399_vm2, %v1398_v3  ;;  %v693_v52 = vpop.permute.xlu1 %692 }
 0x2da   : > { %1289 = vmatprep.subr.mxu1 %v1398_v3 }
 0x2dc   : > { %1287 = vmatmul.mubr.msk.f32.vlgmr.msra.gmra.mxu1 %vm442_vm3, %v693_v52 }
 0x2dd   : > { %1290 = vmatpush3.msra.mxu1 %v583_v30  ;;  %1291 = vmatprep.mubr.msk.f32.mxu1 %vm1399_vm2, %v1398_v3 }
 0x2de   : > { %1294 = vmatprep.subr.mxu1 %v1398_v3 }
 0x398   : > { %v684_v55 = vpop.f32.mrf.mxu1 }
 0x399   : > { %v773_v56 = vsel %vm771_vm4, %v684_v55, -1000000.0 }
 0x39a   : > { %v1283_v57 = vpop.f32.mrf.mxu1  ;;  %v776_v58 = vsel %vm775_vm5, %v773_v56, -inf }
 0x39b   : > { %777 = vmax.xlane.f32.xlu0 %v776_v58 }
 0x39c   : > { %v765_v59 = vpop.f32.mrf.mxu1 }
 0x39d   : > { %v774_v60 = vsel %vm772_vm6, %v765_v59, -1000000.0 }
 0x39e   : > { %v1288_v61 = vpop.f32.mrf.mxu1  ;;  %v779_v62 = vsel %vm775_vm5, %v774_v60, -inf }
 0x39f   : > { %780 = vmax.xlane.f32.xlu1 %v779_v62  ;;  %v564_v62 = vmul.f32 %v1556_v38, %v1544_v26 }
 0x424   : > { %v778_v63 = vpop.xlane.xlu0 %777 }
 0x425   : > { %v782_v0 = vsub.f32 %v773_v56, %v778_v63 }
 0x427   : > { %v784_v1 = vmul.f32 1.442695, %v782_v0 }
 0x428   : > { %v781_v2 = vpop.xlane.xlu1 %780 }
 0x429   : > { %1345 = vpow2.f32 %v784_v1  ;;  %v783_v4 = vsub.f32 %v774_v60, %v781_v2 }
 0x42b   : > { %v786_v5 = vmul.f32 1.442695, %v783_v4 }
 0x42d   : > { %1347 = vpow2.f32 %v786_v5 }
 0x436   : > { %v1346_v6 = vpop.eup %1345 }
 0x437   : > { %v788_v7 = vsel %vm775_vm5, %v1346_v6, 0.0 }
 0x438   : > { %789 = vadd.xlane.f32.xlu0 %v788_v7  ;;  %v1051_v7 = vld [vmem:[#allocation4] sm:$0x1] }
 0x43a   : > { %v1348_v8 = vpop.eup %1347 }
 0x43b   : > { %v791_v9 = vsel %vm775_vm5, %v1348_v8, 0.0 }
 0x43c   : > { %792 = vadd.xlane.f32.xlu0 %v791_v9 }
 0x452   : > { %567 = vrot.lane.b32.xlu0 %v565_v10, %s1402_s22 }
 0x4c1   : > { %v790_v11 = vpop.xlane.xlu0 %789 }
 0x4c2   : > { %1349 = vrcp.f32 %v790_v11 }
 0x4c5   : > { %v793_v12 = vpop.xlane.xlu0 %792 }
 0x4c6   : > { %1351 = vrcp.f32 %v793_v12 }
 0x4c9   : > { %v568_v61 = vpop.permute.xlu0 %567 }
 0x4ca   : > { %v570_v63 = vadd.f32 %v568_v61, %v564_v62 }
 0x4cf   : > { %v1350_v13 = vpop.eup %1349 }
 0x4d0   : > { %v796_v15 = vmul.f32 %v1350_v13, %v1346_v6 }
 0x4d2   : > { %1292 = vmatmul.mubr.msk.f32.vlgmr.msra.gmra.mxu1 %vm798_vm7, %v796_v15 }
 0x4d3   : > { %v1352_v16 = vpop.eup %1351  ;;  %1295 = vmatpush3.msra.mxu1 %v584_v50  ;;  %1296 = vmatprep.mubr.msk.f32.mxu1 %vm1399_vm2, %v1398_v3  ;;  %v1242_v3 = vld [vmem:[%s1661_s8] ss:$0 sm:$0xff] }
 0x4d4   : > { %v797_v17 = vmul.f32 %v1352_v16, %v1348_v8 }
 0x4d6   : > { %1297 = vmatmul.mubr.msk.f32.vlgmr.msra.gmra.mxu1 %vm798_vm7, %v797_v17 }
 0x592   : > { %v868_v21 = vpop.f32.mrf.mxu1 }
 0x593   : > { %v1052_v45 = vmul.f32 %v868_v21, %v868_v21 }
 0x594   : > { %v1293_v22 = vpop.f32.mrf.mxu1 }
 0x596   : > { %v941_v23 = vpop.f32.mrf.mxu1 }
 0x597   : > { %1353 = vtanh.f32 %v941_v23  ;;  %v1053_v47 = vmul.f32 %v941_v23, %v941_v23 }
 0x598   : > { %v1298_v24 = vpop.f32.mrf.mxu1  ;;  %1355 = vtanh.f32 %v868_v21 }
 0x5a4   : > { %v1354_v25 = vpop.eup %1353 }
 0x5a5   : > { %v960_v27 = vrot.slane %v1354_v25, 7  ;;  %v1356_v28 = vpop.eup %1355 }
 0x5a7   : > { %v962_v29 = vsel %vm961_vm8, %v960_v27, %v1356_v28 }
 0x5a8   : > { %1308 = vmatmul.mubr.msk.f32.vlgmr.msra.gmra.mxu0 %vm442_vm3, %v962_v29 }
 0x668   : > { %v1031_v30 = vpop.f32.mrf.mxu0 }
 0x669   : > { %v1032_v31 = vadd.f32 %v1242_v3, %v1031_v30 }
 0x66a   : > { %v1309_v32 = vpop.f32.mrf.mxu0 }
 0x66b   : > { %v1035_v33 = vmul.f32 1.442695, %v1032_v31 }
 0x66d   : > { %1357 = vpow2.f32 %v1035_v33 }
 0x67a   : > { %v1358_v35 = vpop.eup %1357 }
 0x67b   : > { %v1054_v36 = vmul.f32 1.442695, %v1358_v35  ;;  %v1038_v37 = vmul.f32 %v1358_v35, %v1037_v34  ;;  %v1063_v51 = vrot.slane %v1358_v35, 1 }
 0x67d   : > { %1359 = vpow2.f32 %v1054_v36  ;;  %v1040_v39 = vrot.slane %v1038_v37, 1  ;;  %v1043_v41 = vadd.f32 %v1038_v37, %v868_v21 }
 0x67f   : > { %v1044_v40 = vadd.f32 %v1040_v39, %v941_v23 }
 0x681   : > { %v1047_v43 = vrot.slane %v1044_v40, 7 }
 0x683   : > { %v1048_v44 = vsel %vm961_vm8, %v1047_v43, %v1043_v41 }
 0x684   : > { %1050 = vst.msk [vmem:[%s424_s16] sm:$0x3] %vm575_vm9, %v1048_v44 }
 0x68a   : > { %v1360_v46 = vpop.eup %1359 }
 0x68b   : > { %v1057_v48 = vrot.slane %v1360_v46, 1  ;;  %v1060_v49 = vadd.f32 %v1360_v46, %v1052_v45 }
 0x68d   : > { %v1061_v50 = vadd.f32 %v1057_v48, %v1053_v47  ;;  %v1066_v52 = vsub.f32 %v1060_v49, %v1358_v35 }
 0x68f   : > { %v1067_v53 = vsub.f32 %v1061_v50, %v1063_v51  ;;  %v1244_v54 = vadd.f32 -1.0, %v1066_v52 }
 0x691   : > { %v1245_v55 = vadd.f32 -1.0, %v1067_v53  ;;  %v1070_v57 = vmul.f32 0.5, %v1244_v54 }
 0x693   : > { %v1071_v56 = vmul.f32 0.5, %v1245_v55 }
 0x695   : > { %v1074_v58 = vrot.slane %v1071_v56, 7 }
 0x697   : > { %v1075_v59 = vsel %vm961_vm8, %v1074_v58, %v1070_v57 }
 0x698   : > { %v1077_v60 = vsel %vm575_vm9, %v1075_v59, 0.0 }
 0x699   : > { %1078 = vadd.xlane.f32.xlu1 %v1077_v60 }
 0x6aa   : > { %572 = vrot.lane.b32.xlu1 %v1559_v42, %s1402_s22  ;;  %s1405_s22 = smov [#allocation4]  }
 0x6ae   : > { %578 = vrot.lane.b32.xlu1 %v570_v63, %s1403_s27  ;;  %s1112_s27 = sshll.u32 %s1405_s22, 4  ;;  %s1113_s27 = int_to_ptr.vmem [resolvable:$true] %s1112_s27 }
 0x6af   : > { %s1361_s20 = scalar_lea.vmem %s1113_s27, 16  ;;  %p1368_p9 = scmp.lt.s32.totalorder %s1113_s27, %s1113_s27 }
 0x6b0   : > { %p1362_p6 = scmp.ne.s32.totalorder %s1113_s27, %s1361_s20 }
 0x6b2   : > { %p1363_p7 = pnand %p1362_p6, %p1316_p5 }
 0x6b4   : > { %p1364_p8 = pneg %p1363_p7 }
 0x722   : > { %v1079_v0 = vpop.xlane.xlu1 %1078 }
 0x723   : > { %v1080_v1 = vrot.slane %v1079_v0, 4 }
 0x725   : > { %v1081_v2 = vadd.f32 %v1080_v1, %v1079_v0 }
 0x726   : > { %v573_v4 = vpop.permute.xlu1 %572 }
 0x727   : > { %v1082_v5 = vrot.slane %v1081_v2, 2  ;;  %576 = vst.msk [vmem:[#allocation2] sm:$0x3] %vm575_vm9, %v573_v4  ;;  %582 = vst.msk [vmem:[%s420_s13] sm:$0x3] %vm575_vm9, %v573_v4  ;;  %s1367_s13 = scalar_lea.vmem %s1113_s27, 32 }
 0x728   : > { %p1369_p10 = scmp.lt.s32.totalorder %s1367_s13, %s1361_s20 }
 0x729   : > { %v1083_v26 = vadd.f32 %v1082_v5, %v1081_v2 }
 0x72a   : > { %v579_v38 = vpop.permute.xlu1 %578  ;;  %p1370_p11 = por %p1369_p10, %p1368_p9 }
 0x72b   : > { %581 = vst.msk [vmem:[#allocation3] sm:$0x3] %vm575_vm9, %v579_v38  ;;  %v1084_v42 = vrot.slane %v1083_v26, 1 }
 0x72c   : > { %p1371_p12 = pnand %p1370_p11, %p1364_p8 }
 0x72d   : > { %v1085_v6 = vadd.f32 %v1084_v42, %v1083_v26 }
 0x72f   : > { %1310 = vpush %v1085_v6 }
 0x760   : > { %s1311_s23 = spop %1310 }
 0x761   : > { %v1087_v8 = vstv %s1311_s23 }
 0x762   : > { %v1088_v9 = vadd.f32 %v1087_v8, %v1051_v7 }
 0x764   : > { %1090 = vst.msk [vmem:[#allocation4] sm:$0x1] %vm1089_vm10, %v1088_v9 }
 0x765   : > { %1374 = shalt.err (!%p1371_p12)
}
 0x766   : > { %1313 = dma.vmem_to_hbm [thread:$0]  (%p1316_p5), %s1113_s27, 16, %s1664_s11, [#allocation5]  }
 0x767   : > { %1390 = dma.done.wait (%p1316_p5), [#allocation5], 16  }
 0x768   : > { %1392 = vsyncadd (%p1316_p5), [#allocation5], 4294967280 }
 0x769 PF: > { %s23_s17 = sadd.s32 1, %s1395_s17  }
 0x76a   : > { %p20_p13 = scmp.ge.s32.totalorder %s23_s17, 10  }
 0x76c   :  { %22 = sbr.rel (!%p20_p13) target bundleno = 1 (0x1), region = 117 }
 0x771   :  { %1139 = vsyncpa [#allocation5], 1 }
 0x772   :  { %1141 = vsyncpa [#allocation5 + $0x1], 1 }

</bundles_post_ra>
